<compile_context>
chip_gen: v6e
topology: v6e:2x2x1
jax: 0.10.0
libtpu: 0.0.40
codegen_flags: <defaults>
</compile_context>

<pallas_src>
from functools import partial

import numpy as np
import jax
import jax.numpy as jnp
from jax.experimental import pallas as pl
from jax.experimental.pallas import tpu as pltpu

_EPS = 1e-5
# MXU operand dtype for the conv contractions (accumulation is always f32).
_MATMUL_DTYPE = jnp.bfloat16


# -----------------------------------------------------------------------------
# One-time parameter packing helpers (host side, run once in prepare_params)
# -----------------------------------------------------------------------------
def _stats_matrix(width, c, hw):
    """Q with (sum_H x_packed) @ Q = per-channel spatial mean, broadcast back
    over the packed (w*C + c) lane index."""
    q = np.kron(np.ones((width, width), np.float32),
                np.eye(c, dtype=np.float32)) / float(hw)
    return jnp.asarray(q)


def _interp_matrix(out_size, in_size):
    """(out, in) bilinear weights, PyTorch align_corners=True convention."""
    a = np.zeros((out_size, in_size), np.float32)
    if out_size == 1:
        a[0, 0] = 1.0
        return a
    for i in range(out_size):
        src = i * (in_size - 1) / (out_size - 1)
        p0 = int(np.floor(src))
        p1 = min(p0 + 1, in_size - 1)
        w1 = float(src - p0)
        a[i, p0] += 1.0 - w1
        a[i, p1] += w1
    return a


def _pack_conv_slab(w_hwio, width, dtype):
    """(3, 3, Cin, Cout) HWIO -> (3*width*Cin, width*Cout) block-banded slab.

    Packed activation row (h + dy - 1), lane index w*Cin+ci, times the dy-th
    band accumulates output row h, lane ow*Cout+co; the 3 dx taps and the
    W-direction zero padding are folded in via shifted identity matrices.
    """
    w_hwio = w_hwio.astype(jnp.float32)
    cin, cout = w_hwio.shape[2], w_hwio.shape[3]
    slabs = []
    for dy in range(3):
        m = jnp.zeros((width * cin, width * cout), jnp.float32)
        for dx in range(3):
            shift = jnp.asarray(np.eye(width, k=1 - dx, dtype=np.float32))
            m = m + jnp.kron(shift, w_hwio[dy, dx])
        slabs.append(m)
    return jnp.concatenate(slabs, axis=0).astype(dtype)


def _pack_embed_gb(embed_w, c, width):
    """(num_classes, 2C) embedding -> (num_classes, 2, width*C) packed
    gamma/beta table (lane index w*C + c)."""
    gamma = embed_w[:, :c].astype(jnp.float32)
    beta = embed_w[:, c:].astype(jnp.float32)
    return jnp.stack([jnp.tile(gamma, (1, width)),
                      jnp.tile(beta, (1, width))], axis=1)


def prepare_params(params, *, in_planes, features, fine_hw, coarse_hw=None,
                   mm_dtype=_MATMUL_DTYPE):
    """Pack weights/embeddings ONCE into the lane-dense layouts the kernel uses."""
    two_inputs = len(in_planes) == 2
    hf, wf = fine_hw
    packed = {"two_inputs": two_inputs, "features": features,
              "fine_hw": (hf, wf)}
    w = params["conv2d_w"]                               # (3, 3, Cin_total, F)
    if two_inputs:
        c0, c1 = in_planes                               # c0: coarse xs[0]
        h0, w0 = coarse_hw
        packed["coarse_hw"] = (h0, w0)
        packed["gb_fine"] = _pack_embed_gb(params["in2_embed"], c1, wf)
        packed["q_fine"] = _stats_matrix(wf, c1, hf * wf)
        packed["gb_coarse"] = _pack_embed_gb(params["in1_embed"], c0, w0)
        packed["q_coarse"] = _stats_matrix(w0, c0, h0 * w0)
        packed["ah"] = jnp.asarray(_interp_matrix(hf, h0))
        packed["awk"] = jnp.asarray(np.kron(_interp_matrix(wf, w0).T,
                                            np.eye(c0, dtype=np.float32)))
        # cat([h1, h2]): first c1 in-channels <- norm2(xs[1]), then c0 <-
        # resized norm1(xs[0]).
        packed["w_fine"] = _pack_conv_slab(w[:, :, :c1, :], wf, mm_dtype)
        packed["w_coarse"] = _pack_conv_slab(w[:, :, c1:, :], wf, mm_dtype)
    else:
        c0 = in_planes[0]
        packed["gb_fine"] = _pack_embed_gb(params["in1_embed"], c0, wf)
        packed["q_fine"] = _stats_matrix(wf, c0, hf * wf)
        packed["w_fine"] = _pack_conv_slab(w, wf, mm_dtype)
    packed["bias"] = jnp.tile(params["conv2d_b"].astype(jnp.float32),
                              (wf,)).reshape(1, wf * features)
    packed["q_feat"] = _stats_matrix(wf, features, hf * wf)
    rcu = []
    for ne_blk, cw_blk in zip(params["output_rcu"]["norm_embed"],
                              params["output_rcu"]["conv_w"]):
        stages = []
        for ne, cw in zip(ne_blk, cw_blk):
            stages.append((_pack_embed_gb(ne, features, wf),
                           _pack_conv_slab(cw, wf, mm_dtype)))
        rcu.append(stages)
    packed["rcu"] = rcu
    return packed


# -----------------------------------------------------------------------------
# In-kernel helpers (packed (H, W*C) layout, one sample per grid step)
# -----------------------------------------------------------------------------
def _instnorm_packed(x, gb_ref, q_ref):
    """Conditional instance norm in the packed layout (all math in f32)."""
    gb = gb_ref[0]                                   # (2, WC)
    gamma = gb[0:1, :]
    beta = gb[1:2, :]
    s1 = jnp.sum(x, axis=0, keepdims=True)           # (1, WC)
    s2 = jnp.sum(x * x, axis=0, keepdims=True)
    q = q_ref[...]
    mean = jnp.dot(s1, q, preferred_element_type=jnp.float32)
    ex2 = jnp.dot(s2, q, preferred_element_type=jnp.float32)
    var = jnp.maximum(ex2 - mean * mean, 0.0)        # biased variance, clamped
    inv = jax.lax.rsqrt(var + _EPS)
    return (x - mean) * inv * gamma + beta


def _conv3x3_packed(xn, w_slab, d_dn, d_up, mm_dtype):
    """3x3 'same' conv of one packed sample.

    xn: (H, W*Cin) f32; w_slab: (3*W*Cin, W*Cout) block-banded slab.  The dy
    shifts (with H zero padding) come from exact 0/1 shift-matrix matmuls; the
    dx taps / W padding are inside the slab.  bf16 operands, f32 accumulate.
    """
    h_rows, wc_in = xn.shape
    x_dn = jnp.dot(d_dn, xn, preferred_element_type=jnp.float32)   # row h-1
    x_up = jnp.dot(d_up, xn, preferred_element_type=jnp.float32)   # row h+1
    if wc_in % 128 == 0:
        rows = jnp.concatenate([x_dn, xn, x_up], axis=-1).astype(mm_dtype)
        return jnp.dot(rows, w_slab, preferred_element_type=jnp.float32)
    acc = jnp.dot(x_dn.astype(mm_dtype), w_slab[:wc_in],
                  preferred_element_type=jnp.float32)
    acc = acc + jnp.dot(xn.astype(mm_dtype), w_slab[wc_in:2 * wc_in],
                        preferred_element_type=jnp.float32)
    acc = acc + jnp.dot(x_up.astype(mm_dtype), w_slab[2 * wc_in:],
                        preferred_element_type=jnp.float32)
    return acc


def _fused_refine_kernel(*refs, two_inputs, rcu_layout, mm_dtype):
    """Entire MyCondRefineBlock forward for one sample (one grid step)."""
    it = iter(refs)
    x_fine_ref = next(it)
    gb_fine_ref = next(it)
    q_fine_ref = next(it)
    if two_inputs:
        x_coarse_ref = next(it)
        gb_coarse_ref = next(it)
        q_coarse_ref = next(it)
        ah_ref = next(it)
        awk_ref = next(it)
    w_fine_ref = next(it)
    if two_inputs:
        w_coarse_ref = next(it)
    bias_ref = next(it)
    q_feat_ref = next(it)
    rcu = []
    for n_st in rcu_layout:
        rcu.append([(next(it), next(it)) for _ in range(n_st)])
    out_ref = next(it)

    h_rows = x_fine_ref.shape[1]
    # Constant 0/1 row-shift matrices (hoisted: built once, reused by all convs)
    ii = jax.lax.broadcasted_iota(jnp.int32, (h_rows, h_rows), 0)
    jj = jax.lax.broadcasted_iota(jnp.int32, (h_rows, h_rows), 1)
    d_dn = (jj == ii - 1).astype(jnp.float32)   # row i <- row i-1 (row 0 -> 0)
    d_up = (jj == ii + 1).astype(jnp.float32)   # row i <- row i+1 (last -> 0)

    # ---- conv2d over cat([norm2(fine), resize(norm1(coarse))]) + bias -------
    xf = x_fine_ref[0].astype(jnp.float32)                  # (H, W*Cf)
    xf_n = _instnorm_packed(xf, gb_fine_ref, q_fine_ref)
    h = _conv3x3_packed(xf_n, w_fine_ref[...], d_dn, d_up, mm_dtype)
    h = h + bias_ref[...]
    if two_inputs:
        xc = x_coarse_ref[0].astype(jnp.float32)            # (H0, W0*C0)
        xc_n = _instnorm_packed(xc, gb_coarse_ref, q_coarse_ref)
        # bilinear align_corners=True resize: two constant-matrix matmuls
        xc_n = jnp.dot(xc_n, awk_ref[...], preferred_element_type=jnp.float32)
        xc_n = jnp.dot(ah_ref[...], xc_n, preferred_element_type=jnp.float32)
        h = h + _conv3x3_packed(xc_n, w_coarse_ref[...], d_dn, d_up, mm_dtype)

    # ---- output CondRCUBlock: per block, 2x (norm -> ReLU -> conv), + res ---
    x = h
    for stages in rcu:
        residual = x
        for gb_ref, w_ref in stages:
            xa = jnp.maximum(_instnorm_packed(x, gb_ref, q_feat_ref), 0.0)
            x = _conv3x3_packed(xa, w_ref[...], d_dn, d_up, mm_dtype)
        x = x + residual

    out_ref[0] = x.astype(out_ref.dtype)


# -----------------------------------------------------------------------------
# BlockSpec helpers: per-sample blocks split on the leading N axis; parameter
# slabs use constant index maps (stay resident across grid steps).
# -----------------------------------------------------------------------------
def _per_sample_spec(shape):
    rest = (0,) * (len(shape) - 1)
    return pl.BlockSpec((1,) + tuple(shape[1:]), lambda i: (i,) + rest)


def _shared_spec(shape):
    zeros = (0,) * len(shape)
    return pl.BlockSpec(tuple(shape), lambda i: zeros)


# -----------------------------------------------------------------------------
# Forward pass
# -----------------------------------------------------------------------------
def my_cond_refine_block(xs_nchw, y, output_shape, packed):
    two_inputs = packed["two_inputs"]
    features = packed["features"]
    mm_dtype = packed["w_fine"].dtype

    xs = [jnp.transpose(x, (0, 2, 3, 1)) for x in xs_nchw]          # NHWC
    n = xs[0].shape[0]
    x_fine = xs[1] if two_inputs else xs[0]
    _, hf, wf, cf = x_fine.shape
    assert (hf, wf) == tuple(packed["fine_hw"]), "prepacked for other spatial size"

    items = [(x_fine.reshape(n, hf, wf * cf), True),
             (jnp.take(packed["gb_fine"], y, axis=0), True),
             (packed["q_fine"], False)]
    if two_inputs:
        x_coarse = xs[0]
        _, h0, w0, c0 = x_coarse.shape
        assert (h0, w0) == tuple(packed["coarse_hw"])
        assert tuple(output_shape) == (hf, wf), "concat needs matching spatial dims"
        items += [(x_coarse.reshape(n, h0, w0 * c0), True),
                  (jnp.take(packed["gb_coarse"], y, axis=0), True),
                  (packed["q_coarse"], False),
                  (packed["ah"], False),
                  (packed["awk"], False)]
    items += [(packed["w_fine"], False)]
    if two_inputs:
        items += [(packed["w_coarse"], False)]
    items += [(packed["bias"], False), (packed["q_feat"], False)]
    rcu_layout = []
    for blk in packed["rcu"]:
        rcu_layout.append(len(blk))
        for gb_table, w_slab in blk:
            items += [(jnp.take(gb_table, y, axis=0), True), (w_slab, False)]
    rcu_layout = tuple(rcu_layout)

    inputs = [a for a, _ in items]
    in_specs = [_per_sample_spec(a.shape) if ps else _shared_spec(a.shape)
                for a, ps in items]
    out_struct = jax.ShapeDtypeStruct((n, hf, wf * features), x_fine.dtype)

    # Advisory cost estimate + VMEM budget derived from the actual buffers.
    wcf, wcF = wf * cf, wf * features
    n_stages = sum(rcu_layout)
    flops = 4 * wcf * wcf + 6 * hf * wcf * wcF + 4 * hf * hf * wcf
    if two_inputs:
        wc0, wfc0 = w0 * c0, wf * c0
        flops += (4 * wc0 * wc0 + 2 * h0 * wc0 * wfc0 + 2 * hf * h0 * wfc0
                  + 6 * hf * wfc0 * wcF + 4 * hf * hf * wfc0)
    flops += n_stages * (4 * wcF * wcF + 6 * hf * wcF * wcF + 4 * hf * hf * wcF)
    flops *= n
    transcendentals = n * (wcf + (w0 * c0 if two_inputs else 0) + n_stages * wcF)
    in_bytes = sum(int(np.prod(a.shape)) * jnp.dtype(a.dtype).itemsize
                   for a in inputs)
    out_bytes = (int(np.prod(out_struct.shape))
                 * jnp.dtype(out_struct.dtype).itemsize)
    cost = pl.CostEstimate(flops=int(flops),
                           transcendentals=int(transcendentals),
                           bytes_accessed=int(in_bytes + out_bytes))
    # Everything is resident; x8 headroom for double buffering / compiler
    # scratch, capped at v7x's 64 MiB VMEM.
    vmem_limit = int(min(64 * 1024 * 1024,
                         max(16 * 1024 * 1024, 8 * (in_bytes + out_bytes))))

    kern = partial(_fused_refine_kernel, two_inputs=two_inputs,
                   rcu_layout=rcu_layout, mm_dtype=mm_dtype)
    out_p = pl.pallas_call(
        kern,
        out_shape=out_struct,
        grid=(n,),
        in_specs=in_specs,
        out_specs=_per_sample_spec(out_struct.shape),
        compiler_params=pltpu.CompilerParams(
            dimension_semantics=("parallel",),       # megacore sharding on v7x
            vmem_limit_bytes=vmem_limit),
        cost_estimate=cost,
    )(*inputs)

    out = out_p.reshape(n, hf, wf, features)                 # free reshape
    return jnp.transpose(out, (0, 3, 1, 2))                  # back to NCHW


# -----------------------------------------------------------------------------
# Pure-JAX reference (straightforward composition, for correctness check)
# -----------------------------------------------------------------------------
def _embed_lookup(embed_w, y, c):
    e = jnp.take(embed_w, y, axis=0)
    return e[:, :c], e[:, c:]


def _ref_instnorm(x, gamma, beta):
    mean = jnp.mean(x, axis=(1, 2), keepdims=True)
    var = jnp.mean((x - mean) ** 2, axis=(1, 2), keepdims=True)
    h = (x - mean) * jax.lax.rsqrt(var + _EPS)
    return gamma[:, None, None, :] * h + beta[:, None, None, :]


def _ref_bilinear(x, out_hw):
    n, h, w, c = x.shape
    oh, ow = out_hw

    def coords(in_sz, out_sz):
        if out_sz == 1:
            return jnp.zeros((1,), jnp.float32)
        return jnp.linspace(0.0, float(in_sz - 1), out_sz)

    ys, xs_ = coords(h, oh), coords(w, ow)
    y0 = jnp.floor(ys).astype(jnp.int32); y1 = jnp.minimum(y0 + 1, h - 1)
    x0 = jnp.floor(xs_).astype(jnp.int32); x1 = jnp.minimum(x0 + 1, w - 1)
    wy = (ys - y0.astype(jnp.float32)).reshape(1, oh, 1, 1)
    wx = (xs_ - x0.astype(jnp.float32)).reshape(1, 1, ow, 1)
    r0, r1 = x[:, y0], x[:, y1]
    top = r0[:, :, x0] * (1 - wx) + r0[:, :, x1] * wx
    bot = r1[:, :, x0] * (1 - wx) + r1[:, :, x1] * wx
    return top * (1 - wy) + bot * wy


def _ref_conv3x3(x, w, b=None):
    out = jax.lax.conv_general_dilated(
        x, w, window_strides=(1, 1), padding="SAME",
        dimension_numbers=("NHWC", "HWIO", "NHWC"),
        precision=jax.lax.Precision.HIGHEST)
    return out if b is None else out + b


def ref_forward(xs_nchw, y, output_shape, params):
    xs = [jnp.transpose(x, (0, 2, 3, 1)) for x in xs_nchw]
    c0 = xs[0].shape[-1]
    g1, b1 = _embed_lookup(params["in1_embed"], y, c0)
    if len(xs) == 1:
        h = _ref_instnorm(xs[0], g1, b1)
    else:
        h2 = _ref_instnorm(xs[0], g1, b1)
        h2 = _ref_bilinear(h2, output_shape)
        c1 = xs[1].shape[-1]
        g2, b2 = _embed_lookup(params["in2_embed"], y, c1)
        h1 = _ref_instnorm(xs[1], g2, b2)
        h = jnp.concatenate([h1, h2], axis=-1)
    h = _ref_conv3x3(h, params["conv2d_w"], params["conv2d_b"])
    feats = params["conv2d_w"].shape[-1]
    rcu = params["output_rcu"]
    for i in range(len(rcu["conv_w"])):
        residual = h
        for j in range(len(rcu["conv_w"][i])):
            g, b = _embed_lookup(rcu["norm_embed"][i][j], y, feats)
            h = jnp.maximum(_ref_instnorm(h, g, b), 0.0)
            h = _ref_conv3x3(h, rcu["conv_w"][i][j])
        h = h + residual
    return jnp.transpose(h, (0, 3, 1, 2))


# -----------------------------------------------------------------------------
# Deterministic parameter init (shapes follow the PyTorch __init__)
# -----------------------------------------------------------------------------
def _make_embed(key, num_classes, c):
    gamma = jax.random.uniform(key, (num_classes, c), jnp.float32)
    beta = jnp.zeros((num_classes, c), jnp.float32)
    return jnp.concatenate([gamma, beta], axis=-1)


def init_params(key, in_planes, features, num_classes, end=False):
    keys = jax.random.split(key, 20)
    params = {}
    params["in1_embed"] = _make_embed(keys[0], num_classes, in_planes[0])
    if len(in_planes) == 2:
        params["in2_embed"] = _make_embed(keys[1], num_classes, in_planes[1])
    cin_total = sum(in_planes)
    params["conv2d_w"] = 0.1 * jax.random.normal(
        keys[2], (3, 3, cin_total, features), jnp.float32)
    params["conv2d_b"] = 0.1 * jax.random.normal(keys[3], (features,), jnp.float32)
    n_blocks = 3 if end else 1
    n_stages = 2
    norm_embed, conv_w = [], []
    k = 4
    for _ in range(n_blocks):
        ne, cw = [], []
        for _ in range(n_stages):
            ne.append(_make_embed(keys[k], num_classes, features)); k += 1
            cw.append(0.1 * jax.random.normal(
                keys[k], (3, 3, features, features), jnp.float32)); k += 1
        norm_embed.append(ne)
        conv_w.append(cw)
    params["output_rcu"] = {"norm_embed": norm_embed, "conv_w": conv_w}
    return params


# -----------------------------------------------------------------------------
if __name__ == "__main__":
    num_classes = 10
    batch = 2
    features = 8
    output_shape = (16, 16)
    # Tolerance accounts for bf16 MXU operands (f32 accumulation) vs the
    # HIGHEST-precision f32 reference.
    tol = 3e-2

    key = jax.random.PRNGKey(0)
    k_p, k_x0, k_x1, k_p2, k_x2 = jax.random.split(key, 5)
    y = jnp.array([1, 7], dtype=jnp.int32)

    # ---- two-input case: coarse 8x8 map (upsampled) + fine 16x16 map --------
    in_planes = (4, 4)
    params = init_params(k_p, in_planes, features, num_classes, end=False)
    packed = prepare_params(params, in_planes=in_planes, features=features,
                            fine_hw=(16, 16), coarse_hw=(8, 8),
                            mm_dtype=_MATMUL_DTYPE)
    x0 = jax.random.normal(k_x0, (batch, in_planes[0], 8, 8), jnp.float32)
    x1 = jax.random.normal(k_x1, (batch, in_planes[1], 16, 16), jnp.float32)

    fwd = jax.jit(lambda xs, yy: my_cond_refine_block(xs, yy, output_shape, packed))
    out = fwd([x0, x1], y)
    jax.block_until_ready(out)
    assert out.shape == (batch, features, 16, 16), out.shape
    ref = ref_forward([x0, x1], y, output_shape, params)
    err = float(jnp.max(jnp.abs(out - ref)))
    assert err < tol, f"two-input mismatch: max abs err = {err}"

    # ---- single-input case ---------------------------------------------------
    in_planes1 = (4,)
    params1 = init_params(k_p2, in_planes1, features, num_classes, end=False)
    packed1 = prepare_params(params1, in_planes=in_planes1, features=features,
                             fine_hw=(16, 16), mm_dtype=_MATMUL_DTYPE)
    x2 = jax.random.normal(k_x2, (batch, in_planes1[0], 16, 16), jnp.float32)
    fwd1 = jax.jit(lambda xs, yy: my_cond_refine_block(xs, yy, output_shape, packed1))
    out1 = fwd1([x2], y)
    jax.block_until_ready(out1)
    assert out1.shape == (batch, features, 16, 16), out1.shape
    ref1 = ref_forward([x2], y, output_shape, params1)
    err1 = float(jnp.max(jnp.abs(out1 - ref1)))
    assert err1 < tol, f"single-input mismatch: max abs err = {err1}"

    print("KERNEL_OK")
</pallas_src>

<mosaic_0001>
module attributes {stable_mosaic.version = 11 : i64} {
  func.func @_fused_refine_kernel(%arg0: i32, %arg1: memref<1x16x64xf32, #tpu.memory_space<vmem>>, %arg2: memref<1x2x64xf32, #tpu.memory_space<vmem>>, %arg3: memref<64x64xf32, #tpu.memory_space<vmem>>, %arg4: memref<1x8x32xf32, #tpu.memory_space<vmem>>, %arg5: memref<1x2x32xf32, #tpu.memory_space<vmem>>, %arg6: memref<32x32xf32, #tpu.memory_space<vmem>>, %arg7: memref<16x8xf32, #tpu.memory_space<vmem>>, %arg8: memref<32x64xf32, #tpu.memory_space<vmem>>, %arg9: memref<192x128xbf16, #tpu.memory_space<vmem>>, %arg10: memref<192x128xbf16, #tpu.memory_space<vmem>>, %arg11: memref<1x128xf32, #tpu.memory_space<vmem>>, %arg12: memref<128x128xf32, #tpu.memory_space<vmem>>, %arg13: memref<1x2x128xf32, #tpu.memory_space<vmem>>, %arg14: memref<384x128xbf16, #tpu.memory_space<vmem>>, %arg15: memref<1x2x128xf32, #tpu.memory_space<vmem>>, %arg16: memref<384x128xbf16, #tpu.memory_space<vmem>>, %arg17: memref<1x16x128xf32, #tpu.memory_space<vmem>>) attributes {dimension_semantics = [#tpu.dimension_semantics<parallel>], iteration_bounds = array<i64: 2>, scalar_prefetch = 0 : i64, scratch_operands = 0 : i64, tpu.core_type = #tpu.core_type<tc>, window_params = [{transform_indices = @transform_0, window_bounds = array<i64: 1, 16, 64>}, {transform_indices = @transform_1, window_bounds = array<i64: 1, 2, 64>}, {pipeline_mode = #tpu.pipeline_mode<synchronous>, transform_indices = @transform_2, window_bounds = array<i64: 64, 64>}, {transform_indices = @transform_3, window_bounds = array<i64: 1, 8, 32>}, {transform_indices = @transform_4, window_bounds = array<i64: 1, 2, 32>}, {pipeline_mode = #tpu.pipeline_mode<synchronous>, transform_indices = @transform_5, window_bounds = array<i64: 32, 32>}, {pipeline_mode = #tpu.pipeline_mode<synchronous>, transform_indices = @transform_6, window_bounds = array<i64: 16, 8>}, {pipeline_mode = #tpu.pipeline_mode<synchronous>, transform_indices = @transform_7, window_bounds = array<i64: 32, 64>}, {pipeline_mode = #tpu.pipeline_mode<synchronous>, transform_indices = @transform_8, window_bounds = array<i64: 192, 128>}, {pipeline_mode = #tpu.pipeline_mode<synchronous>, transform_indices = @transform_9, window_bounds = array<i64: 192, 128>}, {pipeline_mode = #tpu.pipeline_mode<synchronous>, transform_indices = @transform_10, window_bounds = array<i64: 1, 128>}, {pipeline_mode = #tpu.pipeline_mode<synchronous>, transform_indices = @transform_11, window_bounds = array<i64: 128, 128>}, {transform_indices = @transform_12, window_bounds = array<i64: 1, 2, 128>}, {pipeline_mode = #tpu.pipeline_mode<synchronous>, transform_indices = @transform_13, window_bounds = array<i64: 384, 128>}, {transform_indices = @transform_14, window_bounds = array<i64: 1, 2, 128>}, {pipeline_mode = #tpu.pipeline_mode<synchronous>, transform_indices = @transform_15, window_bounds = array<i64: 384, 128>}, {transform_indices = @transform_16, window_bounds = array<i64: 1, 16, 128>}]} {
    %0 = tpu.iota {dimensions = array<i32: 0>} : vector<16x16xi32>
    %1 = tpu.iota {dimensions = array<i32: 1>} : vector<16x16xi32>
    %c1_i32 = arith.constant 1 : i32
    %2 = vector.broadcast %c1_i32 : i32 to vector<16x16xi32>
    %3 = arith.subi %0, %2 : vector<16x16xi32>
    %4 = arith.cmpi eq, %1, %3 : vector<16x16xi32>
    %5 = arith.extui %4 : vector<16x16xi1> to vector<16x16xi32>
    %6 = arith.sitofp %5 : vector<16x16xi32> to vector<16x16xf32>
    %c1_i32_0 = arith.constant 1 : i32
    %7 = vector.broadcast %c1_i32_0 : i32 to vector<16x16xi32>
    %8 = arith.addi %0, %7 : vector<16x16xi32>
    %9 = arith.cmpi eq, %1, %8 : vector<16x16xi32>
    %10 = arith.extui %9 : vector<16x16xi1> to vector<16x16xi32>
    %11 = arith.sitofp %10 : vector<16x16xi32> to vector<16x16xf32>
    %c0 = arith.constant 0 : index
    %c0_1 = arith.constant 0 : index
    %c0_2 = arith.constant 0 : index
    %12 = vector.load %arg1[%c0, %c0_1, %c0_2] : memref<1x16x64xf32, #tpu.memory_space<vmem>>, vector<1x16x64xf32>
    %13 = vector.shape_cast %12 : vector<1x16x64xf32> to vector<16x64xf32>
    %c0_3 = arith.constant 0 : index
    %c0_4 = arith.constant 0 : index
    %c0_5 = arith.constant 0 : index
    %14 = vector.load %arg2[%c0_3, %c0_4, %c0_5] : memref<1x2x64xf32, #tpu.memory_space<vmem>>, vector<1x2x64xf32>
    %15 = vector.shape_cast %14 : vector<1x2x64xf32> to vector<2x64xf32>
    %16 = vector.extract_strided_slice %15 {offsets = [0, 0], sizes = [1, 64], strides = [1, 1]} : vector<2x64xf32> to vector<1x64xf32>
    %17 = vector.extract_strided_slice %15 {offsets = [1, 0], sizes = [1, 64], strides = [1, 1]} : vector<2x64xf32> to vector<1x64xf32>
    %cst = arith.constant dense<0.000000e+00> : vector<64xf32>
    %18 = vector.multi_reduction <add>, %13, %cst [0] : vector<16x64xf32> to vector<64xf32>
    %19 = vector.shape_cast %18 : vector<64xf32> to vector<1x64xf32>
    %20 = arith.mulf %13, %13 : vector<16x64xf32>
    %cst_6 = arith.constant dense<0.000000e+00> : vector<64xf32>
    %21 = vector.multi_reduction <add>, %20, %cst_6 [0] : vector<16x64xf32> to vector<64xf32>
    %22 = vector.shape_cast %21 : vector<64xf32> to vector<1x64xf32>
    %c0_7 = arith.constant 0 : index
    %c0_8 = arith.constant 0 : index
    %23 = vector.load %arg3[%c0_7, %c0_8] : memref<64x64xf32, #tpu.memory_space<vmem>>, vector<64x64xf32>
    %cst_9 = arith.constant dense<0.000000e+00> : vector<1x64xf32>
    %24 = tpu.matmul %19, %23, %cst_9 {dimension_numbers = #tpu.dot_dimension_numbers<[1], [0], [0], [1], [0, 0, 1, 1], [], []>} : vector<1x64xf32>, vector<64x64xf32>, vector<1x64xf32> -> vector<1x64xf32>
    %cst_10 = arith.constant dense<0.000000e+00> : vector<1x64xf32>
    %25 = tpu.matmul %22, %23, %cst_10 {dimension_numbers = #tpu.dot_dimension_numbers<[1], [0], [0], [1], [0, 0, 1, 1], [], []>} : vector<1x64xf32>, vector<64x64xf32>, vector<1x64xf32> -> vector<1x64xf32>
    %26 = arith.mulf %24, %24 : vector<1x64xf32>
    %27 = arith.subf %25, %26 : vector<1x64xf32>
    %cst_11 = arith.constant 0.000000e+00 : f32
    %28 = vector.broadcast %cst_11 : f32 to vector<1x64xf32>
    %29 = arith.maximumf %27, %28 : vector<1x64xf32>
    %cst_12 = arith.constant 9.99999974E-6 : f32
    %30 = vector.broadcast %cst_12 : f32 to vector<1x64xf32>
    %31 = arith.addf %29, %30 : vector<1x64xf32>
    %32 = math.rsqrt %31 : vector<1x64xf32>
    %33 = vector.broadcast %24 : vector<1x64xf32> to vector<16x64xf32>
    %34 = arith.subf %13, %33 : vector<16x64xf32>
    %35 = vector.broadcast %32 : vector<1x64xf32> to vector<16x64xf32>
    %36 = arith.mulf %34, %35 : vector<16x64xf32>
    %37 = vector.broadcast %16 : vector<1x64xf32> to vector<16x64xf32>
    %38 = arith.mulf %36, %37 : vector<16x64xf32>
    %39 = vector.broadcast %17 : vector<1x64xf32> to vector<16x64xf32>
    %40 = arith.addf %38, %39 : vector<16x64xf32>
    %c0_13 = arith.constant 0 : index
    %c0_14 = arith.constant 0 : index
    %41 = vector.load %arg9[%c0_13, %c0_14] : memref<192x128xbf16, #tpu.memory_space<vmem>>, vector<192x128xbf16>
    %cst_15 = arith.constant dense<0.000000e+00> : vector<16x64xf32>
    %42 = tpu.matmul %6, %40, %cst_15 {dimension_numbers = #tpu.dot_dimension_numbers<[1], [0], [0], [1], [0, 0, 1, 1], [], []>} : vector<16x16xf32>, vector<16x64xf32>, vector<16x64xf32> -> vector<16x64xf32>
    %cst_16 = arith.constant dense<0.000000e+00> : vector<16x64xf32>
    %43 = tpu.matmul %11, %40, %cst_16 {dimension_numbers = #tpu.dot_dimension_numbers<[1], [0], [0], [1], [0, 0, 1, 1], [], []>} : vector<16x16xf32>, vector<16x64xf32>, vector<16x64xf32> -> vector<16x64xf32>
    %44 = arith.truncf %42 : vector<16x64xf32> to vector<16x64xbf16>
    %45 = vector.extract_strided_slice %41 {offsets = [0, 0], sizes = [64, 128], strides = [1, 1]} : vector<192x128xbf16> to vector<64x128xbf16>
    %cst_17 = arith.constant dense<0.000000e+00> : vector<16x128xf32>
    %46 = tpu.matmul %44, %45, %cst_17 {dimension_numbers = #tpu.dot_dimension_numbers<[1], [0], [0], [1], [0, 0, 1, 1], [], []>} : vector<16x64xbf16>, vector<64x128xbf16>, vector<16x128xf32> -> vector<16x128xf32>
    %47 = arith.truncf %40 : vector<16x64xf32> to vector<16x64xbf16>
    %48 = vector.extract_strided_slice %41 {offsets = [64, 0], sizes = [64, 128], strides = [1, 1]} : vector<192x128xbf16> to vector<64x128xbf16>
    %cst_18 = arith.constant dense<0.000000e+00> : vector<16x128xf32>
    %49 = tpu.matmul %47, %48, %cst_18 {dimension_numbers = #tpu.dot_dimension_numbers<[1], [0], [0], [1], [0, 0, 1, 1], [], []>} : vector<16x64xbf16>, vector<64x128xbf16>, vector<16x128xf32> -> vector<16x128xf32>
    %50 = arith.addf %46, %49 : vector<16x128xf32>
    %51 = arith.truncf %43 : vector<16x64xf32> to vector<16x64xbf16>
    %52 = vector.extract_strided_slice %41 {offsets = [128, 0], sizes = [64, 128], strides = [1, 1]} : vector<192x128xbf16> to vector<64x128xbf16>
    %cst_19 = arith.constant dense<0.000000e+00> : vector<16x128xf32>
    %53 = tpu.matmul %51, %52, %cst_19 {dimension_numbers = #tpu.dot_dimension_numbers<[1], [0], [0], [1], [0, 0, 1, 1], [], []>} : vector<16x64xbf16>, vector<64x128xbf16>, vector<16x128xf32> -> vector<16x128xf32>
    %54 = arith.addf %50, %53 : vector<16x128xf32>
    %c0_20 = arith.constant 0 : index
    %c0_21 = arith.constant 0 : index
    %55 = vector.load %arg11[%c0_20, %c0_21] : memref<1x128xf32, #tpu.memory_space<vmem>>, vector<1x128xf32>
    %56 = vector.broadcast %55 : vector<1x128xf32> to vector<16x128xf32>
    %57 = arith.addf %54, %56 : vector<16x128xf32>
    %c0_22 = arith.constant 0 : index
    %c0_23 = arith.constant 0 : index
    %c0_24 = arith.constant 0 : index
    %58 = vector.load %arg4[%c0_22, %c0_23, %c0_24] : memref<1x8x32xf32, #tpu.memory_space<vmem>>, vector<1x8x32xf32>
    %59 = vector.shape_cast %58 : vector<1x8x32xf32> to vector<8x32xf32>
    %c0_25 = arith.constant 0 : index
    %c0_26 = arith.constant 0 : index
    %c0_27 = arith.constant 0 : index
    %60 = vector.load %arg5[%c0_25, %c0_26, %c0_27] : memref<1x2x32xf32, #tpu.memory_space<vmem>>, vector<1x2x32xf32>
    %61 = vector.shape_cast %60 : vector<1x2x32xf32> to vector<2x32xf32>
    %62 = vector.extract_strided_slice %61 {offsets = [0, 0], sizes = [1, 32], strides = [1, 1]} : vector<2x32xf32> to vector<1x32xf32>
    %63 = vector.extract_strided_slice %61 {offsets = [1, 0], sizes = [1, 32], strides = [1, 1]} : vector<2x32xf32> to vector<1x32xf32>
    %cst_28 = arith.constant dense<0.000000e+00> : vector<32xf32>
    %64 = vector.multi_reduction <add>, %59, %cst_28 [0] : vector<8x32xf32> to vector<32xf32>
    %65 = vector.shape_cast %64 : vector<32xf32> to vector<1x32xf32>
    %66 = arith.mulf %59, %59 : vector<8x32xf32>
    %cst_29 = arith.constant dense<0.000000e+00> : vector<32xf32>
    %67 = vector.multi_reduction <add>, %66, %cst_29 [0] : vector<8x32xf32> to vector<32xf32>
    %68 = vector.shape_cast %67 : vector<32xf32> to vector<1x32xf32>
    %c0_30 = arith.constant 0 : index
    %c0_31 = arith.constant 0 : index
    %69 = vector.load %arg6[%c0_30, %c0_31] : memref<32x32xf32, #tpu.memory_space<vmem>>, vector<32x32xf32>
    %cst_32 = arith.constant dense<0.000000e+00> : vector<1x32xf32>
    %70 = tpu.matmul %65, %69, %cst_32 {dimension_numbers = #tpu.dot_dimension_numbers<[1], [0], [0], [1], [0, 0, 1, 1], [], []>} : vector<1x32xf32>, vector<32x32xf32>, vector<1x32xf32> -> vector<1x32xf32>
    %cst_33 = arith.constant dense<0.000000e+00> : vector<1x32xf32>
    %71 = tpu.matmul %68, %69, %cst_33 {dimension_numbers = #tpu.dot_dimension_numbers<[1], [0], [0], [1], [0, 0, 1, 1], [], []>} : vector<1x32xf32>, vector<32x32xf32>, vector<1x32xf32> -> vector<1x32xf32>
    %72 = arith.mulf %70, %70 : vector<1x32xf32>
    %73 = arith.subf %71, %72 : vector<1x32xf32>
    %cst_34 = arith.constant 0.000000e+00 : f32
    %74 = vector.broadcast %cst_34 : f32 to vector<1x32xf32>
    %75 = arith.maximumf %73, %74 : vector<1x32xf32>
    %cst_35 = arith.constant 9.99999974E-6 : f32
    %76 = vector.broadcast %cst_35 : f32 to vector<1x32xf32>
    %77 = arith.addf %75, %76 : vector<1x32xf32>
    %78 = math.rsqrt %77 : vector<1x32xf32>
    %79 = vector.broadcast %70 : vector<1x32xf32> to vector<8x32xf32>
    %80 = arith.subf %59, %79 : vector<8x32xf32>
    %81 = vector.broadcast %78 : vector<1x32xf32> to vector<8x32xf32>
    %82 = arith.mulf %80, %81 : vector<8x32xf32>
    %83 = vector.broadcast %62 : vector<1x32xf32> to vector<8x32xf32>
    %84 = arith.mulf %82, %83 : vector<8x32xf32>
    %85 = vector.broadcast %63 : vector<1x32xf32> to vector<8x32xf32>
    %86 = arith.addf %84, %85 : vector<8x32xf32>
    %c0_36 = arith.constant 0 : index
    %c0_37 = arith.constant 0 : index
    %87 = vector.load %arg8[%c0_36, %c0_37] : memref<32x64xf32, #tpu.memory_space<vmem>>, vector<32x64xf32>
    %cst_38 = arith.constant dense<0.000000e+00> : vector<8x64xf32>
    %88 = tpu.matmul %86, %87, %cst_38 {dimension_numbers = #tpu.dot_dimension_numbers<[1], [0], [0], [1], [0, 0, 1, 1], [], []>} : vector<8x32xf32>, vector<32x64xf32>, vector<8x64xf32> -> vector<8x64xf32>
    %c0_39 = arith.constant 0 : index
    %c0_40 = arith.constant 0 : index
    %89 = vector.load %arg7[%c0_39, %c0_40] : memref<16x8xf32, #tpu.memory_space<vmem>>, vector<16x8xf32>
    %cst_41 = arith.constant dense<0.000000e+00> : vector<16x64xf32>
    %90 = tpu.matmul %89, %88, %cst_41 {dimension_numbers = #tpu.dot_dimension_numbers<[1], [0], [0], [1], [0, 0, 1, 1], [], []>} : vector<16x8xf32>, vector<8x64xf32>, vector<16x64xf32> -> vector<16x64xf32>
    %c0_42 = arith.constant 0 : index
    %c0_43 = arith.constant 0 : index
    %91 = vector.load %arg10[%c0_42, %c0_43] : memref<192x128xbf16, #tpu.memory_space<vmem>>, vector<192x128xbf16>
    %cst_44 = arith.constant dense<0.000000e+00> : vector<16x64xf32>
    %92 = tpu.matmul %6, %90, %cst_44 {dimension_numbers = #tpu.dot_dimension_numbers<[1], [0], [0], [1], [0, 0, 1, 1], [], []>} : vector<16x16xf32>, vector<16x64xf32>, vector<16x64xf32> -> vector<16x64xf32>
    %cst_45 = arith.constant dense<0.000000e+00> : vector<16x64xf32>
    %93 = tpu.matmul %11, %90, %cst_45 {dimension_numbers = #tpu.dot_dimension_numbers<[1], [0], [0], [1], [0, 0, 1, 1], [], []>} : vector<16x16xf32>, vector<16x64xf32>, vector<16x64xf32> -> vector<16x64xf32>
    %94 = arith.truncf %92 : vector<16x64xf32> to vector<16x64xbf16>
    %95 = vector.extract_strided_slice %91 {offsets = [0, 0], sizes = [64, 128], strides = [1, 1]} : vector<192x128xbf16> to vector<64x128xbf16>
    %cst_46 = arith.constant dense<0.000000e+00> : vector<16x128xf32>
    %96 = tpu.matmul %94, %95, %cst_46 {dimension_numbers = #tpu.dot_dimension_numbers<[1], [0], [0], [1], [0, 0, 1, 1], [], []>} : vector<16x64xbf16>, vector<64x128xbf16>, vector<16x128xf32> -> vector<16x128xf32>
    %97 = arith.truncf %90 : vector<16x64xf32> to vector<16x64xbf16>
    %98 = vector.extract_strided_slice %91 {offsets = [64, 0], sizes = [64, 128], strides = [1, 1]} : vector<192x128xbf16> to vector<64x128xbf16>
    %cst_47 = arith.constant dense<0.000000e+00> : vector<16x128xf32>
    %99 = tpu.matmul %97, %98, %cst_47 {dimension_numbers = #tpu.dot_dimension_numbers<[1], [0], [0], [1], [0, 0, 1, 1], [], []>} : vector<16x64xbf16>, vector<64x128xbf16>, vector<16x128xf32> -> vector<16x128xf32>
    %100 = arith.addf %96, %99 : vector<16x128xf32>
    %101 = arith.truncf %93 : vector<16x64xf32> to vector<16x64xbf16>
    %102 = vector.extract_strided_slice %91 {offsets = [128, 0], sizes = [64, 128], strides = [1, 1]} : vector<192x128xbf16> to vector<64x128xbf16>
    %cst_48 = arith.constant dense<0.000000e+00> : vector<16x128xf32>
    %103 = tpu.matmul %101, %102, %cst_48 {dimension_numbers = #tpu.dot_dimension_numbers<[1], [0], [0], [1], [0, 0, 1, 1], [], []>} : vector<16x64xbf16>, vector<64x128xbf16>, vector<16x128xf32> -> vector<16x128xf32>
    %104 = arith.addf %100, %103 : vector<16x128xf32>
    %105 = arith.addf %57, %104 : vector<16x128xf32>
    %c0_49 = arith.constant 0 : index
    %c0_50 = arith.constant 0 : index
    %c0_51 = arith.constant 0 : index
    %106 = vector.load %arg13[%c0_49, %c0_50, %c0_51] : memref<1x2x128xf32, #tpu.memory_space<vmem>>, vector<1x2x128xf32>
    %107 = vector.shape_cast %106 : vector<1x2x128xf32> to vector<2x128xf32>
    %108 = vector.extract_strided_slice %107 {offsets = [0, 0], sizes = [1, 128], strides = [1, 1]} : vector<2x128xf32> to vector<1x128xf32>
    %109 = vector.extract_strided_slice %107 {offsets = [1, 0], sizes = [1, 128], strides = [1, 1]} : vector<2x128xf32> to vector<1x128xf32>
    %cst_52 = arith.constant dense<0.000000e+00> : vector<128xf32>
    %110 = vector.multi_reduction <add>, %105, %cst_52 [0] : vector<16x128xf32> to vector<128xf32>
    %111 = vector.shape_cast %110 : vector<128xf32> to vector<1x128xf32>
    %112 = arith.mulf %105, %105 : vector<16x128xf32>
    %cst_53 = arith.constant dense<0.000000e+00> : vector<128xf32>
    %113 = vector.multi_reduction <add>, %112, %cst_53 [0] : vector<16x128xf32> to vector<128xf32>
    %114 = vector.shape_cast %113 : vector<128xf32> to vector<1x128xf32>
    %c0_54 = arith.constant 0 : index
    %c0_55 = arith.constant 0 : index
    %115 = vector.load %arg12[%c0_54, %c0_55] : memref<128x128xf32, #tpu.memory_space<vmem>>, vector<128x128xf32>
    %cst_56 = arith.constant dense<0.000000e+00> : vector<1x128xf32>
    %116 = tpu.matmul %111, %115, %cst_56 {dimension_numbers = #tpu.dot_dimension_numbers<[1], [0], [0], [1], [0, 0, 1, 1], [], []>} : vector<1x128xf32>, vector<128x128xf32>, vector<1x128xf32> -> vector<1x128xf32>
    %cst_57 = arith.constant dense<0.000000e+00> : vector<1x128xf32>
    %117 = tpu.matmul %114, %115, %cst_57 {dimension_numbers = #tpu.dot_dimension_numbers<[1], [0], [0], [1], [0, 0, 1, 1], [], []>} : vector<1x128xf32>, vector<128x128xf32>, vector<1x128xf32> -> vector<1x128xf32>
    %118 = arith.mulf %116, %116 : vector<1x128xf32>
    %119 = arith.subf %117, %118 : vector<1x128xf32>
    %cst_58 = arith.constant 0.000000e+00 : f32
    %120 = vector.broadcast %cst_58 : f32 to vector<1x128xf32>
    %121 = arith.maximumf %119, %120 : vector<1x128xf32>
    %cst_59 = arith.constant 9.99999974E-6 : f32
    %122 = vector.broadcast %cst_59 : f32 to vector<1x128xf32>
    %123 = arith.addf %121, %122 : vector<1x128xf32>
    %124 = math.rsqrt %123 : vector<1x128xf32>
    %125 = vector.broadcast %116 : vector<1x128xf32> to vector<16x128xf32>
    %126 = arith.subf %105, %125 : vector<16x128xf32>
    %127 = vector.broadcast %124 : vector<1x128xf32> to vector<16x128xf32>
    %128 = arith.mulf %126, %127 : vector<16x128xf32>
    %129 = vector.broadcast %108 : vector<1x128xf32> to vector<16x128xf32>
    %130 = arith.mulf %128, %129 : vector<16x128xf32>
    %131 = vector.broadcast %109 : vector<1x128xf32> to vector<16x128xf32>
    %132 = arith.addf %130, %131 : vector<16x128xf32>
    %cst_60 = arith.constant 0.000000e+00 : f32
    %133 = vector.broadcast %cst_60 : f32 to vector<16x128xf32>
    %134 = arith.maximumf %132, %133 : vector<16x128xf32>
    %c0_61 = arith.constant 0 : index
    %c0_62 = arith.constant 0 : index
    %135 = vector.load %arg14[%c0_61, %c0_62] : memref<384x128xbf16, #tpu.memory_space<vmem>>, vector<384x128xbf16>
    %cst_63 = arith.constant dense<0.000000e+00> : vector<16x128xf32>
    %136 = tpu.matmul %6, %134, %cst_63 {dimension_numbers = #tpu.dot_dimension_numbers<[1], [0], [0], [1], [0, 0, 1, 1], [], []>} : vector<16x16xf32>, vector<16x128xf32>, vector<16x128xf32> -> vector<16x128xf32>
    %cst_64 = arith.constant dense<0.000000e+00> : vector<16x128xf32>
    %137 = tpu.matmul %11, %134, %cst_64 {dimension_numbers = #tpu.dot_dimension_numbers<[1], [0], [0], [1], [0, 0, 1, 1], [], []>} : vector<16x16xf32>, vector<16x128xf32>, vector<16x128xf32> -> vector<16x128xf32>
    %138 = tpu.concatenate %136, %134, %137 in 1 : vector<16x128xf32>, vector<16x128xf32>, vector<16x128xf32> -> vector<16x384xf32>
    %139 = arith.truncf %138 : vector<16x384xf32> to vector<16x384xbf16>
    %cst_65 = arith.constant dense<0.000000e+00> : vector<16x128xf32>
    %140 = tpu.matmul %139, %135, %cst_65 {dimension_numbers = #tpu.dot_dimension_numbers<[1], [0], [0], [1], [0, 0, 1, 1], [], []>} : vector<16x384xbf16>, vector<384x128xbf16>, vector<16x128xf32> -> vector<16x128xf32>
    %c0_66 = arith.constant 0 : index
    %c0_67 = arith.constant 0 : index
    %c0_68 = arith.constant 0 : index
    %141 = vector.load %arg15[%c0_66, %c0_67, %c0_68] : memref<1x2x128xf32, #tpu.memory_space<vmem>>, vector<1x2x128xf32>
    %142 = vector.shape_cast %141 : vector<1x2x128xf32> to vector<2x128xf32>
    %143 = vector.extract_strided_slice %142 {offsets = [0, 0], sizes = [1, 128], strides = [1, 1]} : vector<2x128xf32> to vector<1x128xf32>
    %144 = vector.extract_strided_slice %142 {offsets = [1, 0], sizes = [1, 128], strides = [1, 1]} : vector<2x128xf32> to vector<1x128xf32>
    %cst_69 = arith.constant dense<0.000000e+00> : vector<128xf32>
    %145 = vector.multi_reduction <add>, %140, %cst_69 [0] : vector<16x128xf32> to vector<128xf32>
    %146 = vector.shape_cast %145 : vector<128xf32> to vector<1x128xf32>
    %147 = arith.mulf %140, %140 : vector<16x128xf32>
    %cst_70 = arith.constant dense<0.000000e+00> : vector<128xf32>
    %148 = vector.multi_reduction <add>, %147, %cst_70 [0] : vector<16x128xf32> to vector<128xf32>
    %149 = vector.shape_cast %148 : vector<128xf32> to vector<1x128xf32>
    %c0_71 = arith.constant 0 : index
    %c0_72 = arith.constant 0 : index
    %150 = vector.load %arg12[%c0_71, %c0_72] : memref<128x128xf32, #tpu.memory_space<vmem>>, vector<128x128xf32>
    %cst_73 = arith.constant dense<0.000000e+00> : vector<1x128xf32>
    %151 = tpu.matmul %146, %150, %cst_73 {dimension_numbers = #tpu.dot_dimension_numbers<[1], [0], [0], [1], [0, 0, 1, 1], [], []>} : vector<1x128xf32>, vector<128x128xf32>, vector<1x128xf32> -> vector<1x128xf32>
    %cst_74 = arith.constant dense<0.000000e+00> : vector<1x128xf32>
    %152 = tpu.matmul %149, %150, %cst_74 {dimension_numbers = #tpu.dot_dimension_numbers<[1], [0], [0], [1], [0, 0, 1, 1], [], []>} : vector<1x128xf32>, vector<128x128xf32>, vector<1x128xf32> -> vector<1x128xf32>
    %153 = arith.mulf %151, %151 : vector<1x128xf32>
    %154 = arith.subf %152, %153 : vector<1x128xf32>
    %cst_75 = arith.constant 0.000000e+00 : f32
    %155 = vector.broadcast %cst_75 : f32 to vector<1x128xf32>
    %156 = arith.maximumf %154, %155 : vector<1x128xf32>
    %cst_76 = arith.constant 9.99999974E-6 : f32
    %157 = vector.broadcast %cst_76 : f32 to vector<1x128xf32>
    %158 = arith.addf %156, %157 : vector<1x128xf32>
    %159 = math.rsqrt %158 : vector<1x128xf32>
    %160 = vector.broadcast %151 : vector<1x128xf32> to vector<16x128xf32>
    %161 = arith.subf %140, %160 : vector<16x128xf32>
    %162 = vector.broadcast %159 : vector<1x128xf32> to vector<16x128xf32>
    %163 = arith.mulf %161, %162 : vector<16x128xf32>
    %164 = vector.broadcast %143 : vector<1x128xf32> to vector<16x128xf32>
    %165 = arith.mulf %163, %164 : vector<16x128xf32>
    %166 = vector.broadcast %144 : vector<1x128xf32> to vector<16x128xf32>
    %167 = arith.addf %165, %166 : vector<16x128xf32>
    %cst_77 = arith.constant 0.000000e+00 : f32
    %168 = vector.broadcast %cst_77 : f32 to vector<16x128xf32>
    %169 = arith.maximumf %167, %168 : vector<16x128xf32>
    %c0_78 = arith.constant 0 : index
    %c0_79 = arith.constant 0 : index
    %170 = vector.load %arg16[%c0_78, %c0_79] : memref<384x128xbf16, #tpu.memory_space<vmem>>, vector<384x128xbf16>
    %cst_80 = arith.constant dense<0.000000e+00> : vector<16x128xf32>
    %171 = tpu.matmul %6, %169, %cst_80 {dimension_numbers = #tpu.dot_dimension_numbers<[1], [0], [0], [1], [0, 0, 1, 1], [], []>} : vector<16x16xf32>, vector<16x128xf32>, vector<16x128xf32> -> vector<16x128xf32>
    %cst_81 = arith.constant dense<0.000000e+00> : vector<16x128xf32>
    %172 = tpu.matmul %11, %169, %cst_81 {dimension_numbers = #tpu.dot_dimension_numbers<[1], [0], [0], [1], [0, 0, 1, 1], [], []>} : vector<16x16xf32>, vector<16x128xf32>, vector<16x128xf32> -> vector<16x128xf32>
    %173 = tpu.concatenate %171, %169, %172 in 1 : vector<16x128xf32>, vector<16x128xf32>, vector<16x128xf32> -> vector<16x384xf32>
    %174 = arith.truncf %173 : vector<16x384xf32> to vector<16x384xbf16>
    %cst_82 = arith.constant dense<0.000000e+00> : vector<16x128xf32>
    %175 = tpu.matmul %174, %170, %cst_82 {dimension_numbers = #tpu.dot_dimension_numbers<[1], [0], [0], [1], [0, 0, 1, 1], [], []>} : vector<16x384xbf16>, vector<384x128xbf16>, vector<16x128xf32> -> vector<16x128xf32>
    %176 = arith.addf %175, %105 : vector<16x128xf32>
    %c0_83 = arith.constant 0 : index
    %c0_84 = arith.constant 0 : index
    %c0_85 = arith.constant 0 : index
    %177 = vector.load %arg17[%c0_83, %c0_84, %c0_85] : memref<1x16x128xf32, #tpu.memory_space<vmem>>, vector<1x16x128xf32>
    %178 = vector.shape_cast %177 : vector<1x16x128xf32> to vector<16x128xf32>
    %179 = vector.shape_cast %176 : vector<16x128xf32> to vector<1x16x128xf32>
    tpu.vector_store %arg17[%c0_83, %c0_84, %c0_85], %179 {strides = array<i32>} : memref<1x16x128xf32, #tpu.memory_space<vmem>>, vector<1x16x128xf32>,
    return
  }
  func.func @transform_0(%arg0: i32) -> (i32, i32, i32) {
    %c0_i32 = arith.constant 0 : i32
    %c0_i32_0 = arith.constant 0 : i32
    %c0_i32_1 = arith.constant 0 : i32
    return %arg0, %c0_i32, %c0_i32_0 : i32, i32, i32
  }
  func.func @transform_1(%arg0: i32) -> (i32, i32, i32) {
    %c0_i32 = arith.constant 0 : i32
    %c0_i32_0 = arith.constant 0 : i32
    %c0_i32_1 = arith.constant 0 : i32
    return %arg0, %c0_i32, %c0_i32_0 : i32, i32, i32
  }
  func.func @transform_2(%arg0: i32) -> (i32, i32) {
    %c0_i32 = arith.constant 0 : i32
    %c0_i32_0 = arith.constant 0 : i32
    %c0_i32_1 = arith.constant 0 : i32
    return %c0_i32, %c0_i32_0 : i32, i32
  }
  func.func @transform_3(%arg0: i32) -> (i32, i32, i32) {
    %c0_i32 = arith.constant 0 : i32
    %c0_i32_0 = arith.constant 0 : i32
    %c0_i32_1 = arith.constant 0 : i32
    return %arg0, %c0_i32, %c0_i32_0 : i32, i32, i32
  }
  func.func @transform_4(%arg0: i32) -> (i32, i32, i32) {
    %c0_i32 = arith.constant 0 : i32
    %c0_i32_0 = arith.constant 0 : i32
    %c0_i32_1 = arith.constant 0 : i32
    return %arg0, %c0_i32, %c0_i32_0 : i32, i32, i32
  }
  func.func @transform_5(%arg0: i32) -> (i32, i32) {
    %c0_i32 = arith.constant 0 : i32
    %c0_i32_0 = arith.constant 0 : i32
    %c0_i32_1 = arith.constant 0 : i32
    return %c0_i32, %c0_i32_0 : i32, i32
  }
  func.func @transform_6(%arg0: i32) -> (i32, i32) {
    %c0_i32 = arith.constant 0 : i32
    %c0_i32_0 = arith.constant 0 : i32
    %c0_i32_1 = arith.constant 0 : i32
    return %c0_i32, %c0_i32_0 : i32, i32
  }
  func.func @transform_7(%arg0: i32) -> (i32, i32) {
    %c0_i32 = arith.constant 0 : i32
    %c0_i32_0 = arith.constant 0 : i32
    %c0_i32_1 = arith.constant 0 : i32
    return %c0_i32, %c0_i32_0 : i32, i32
  }
  func.func @transform_8(%arg0: i32) -> (i32, i32) {
    %c0_i32 = arith.constant 0 : i32
    %c0_i32_0 = arith.constant 0 : i32
    %c0_i32_1 = arith.constant 0 : i32
    return %c0_i32, %c0_i32_0 : i32, i32
  }
  func.func @transform_9(%arg0: i32) -> (i32, i32) {
    %c0_i32 = arith.constant 0 : i32
    %c0_i32_0 = arith.constant 0 : i32
    %c0_i32_1 = arith.constant 0 : i32
    return %c0_i32, %c0_i32_0 : i32, i32
  }
  func.func @transform_10(%arg0: i32) -> (i32, i32) {
    %c0_i32 = arith.constant 0 : i32
    %c0_i32_0 = arith.constant 0 : i32
    %c0_i32_1 = arith.constant 0 : i32
    return %c0_i32, %c0_i32_0 : i32, i32
  }
  func.func @transform_11(%arg0: i32) -> (i32, i32) {
    %c0_i32 = arith.constant 0 : i32
    %c0_i32_0 = arith.constant 0 : i32
    %c0_i32_1 = arith.constant 0 : i32
    return %c0_i32, %c0_i32_0 : i32, i32
  }
  func.func @transform_12(%arg0: i32) -> (i32, i32, i32) {
    %c0_i32 = arith.constant 0 : i32
    %c0_i32_0 = arith.constant 0 : i32
    %c0_i32_1 = arith.constant 0 : i32
    return %arg0, %c0_i32, %c0_i32_0 : i32, i32, i32
  }
  func.func @transform_13(%arg0: i32) -> (i32, i32) {
    %c0_i32 = arith.constant 0 : i32
    %c0_i32_0 = arith.constant 0 : i32
    %c0_i32_1 = arith.constant 0 : i32
    return %c0_i32, %c0_i32_0 : i32, i32
  }
  func.func @transform_14(%arg0: i32) -> (i32, i32, i32) {
    %c0_i32 = arith.constant 0 : i32
    %c0_i32_0 = arith.constant 0 : i32
    %c0_i32_1 = arith.constant 0 : i32
    return %arg0, %c0_i32, %c0_i32_0 : i32, i32, i32
  }
  func.func @transform_15(%arg0: i32) -> (i32, i32) {
    %c0_i32 = arith.constant 0 : i32
    %c0_i32_0 = arith.constant 0 : i32
    %c0_i32_1 = arith.constant 0 : i32
    return %c0_i32, %c0_i32_0 : i32, i32
  }
  func.func @transform_16(%arg0: i32) -> (i32, i32, i32) {
    %c0_i32 = arith.constant 0 : i32
    %c0_i32_0 = arith.constant 0 : i32
    %c0_i32_1 = arith.constant 0 : i32
    return %arg0, %c0_i32, %c0_i32_0 : i32, i32, i32
  }
}

</mosaic_0001>

<bundles_post_ra>
// kernel: _lambda_.1
= control target key start
LH: loop header
LB: loop body
LE: loop exit
PB: predicated region body
PF: predicated region fallthrough
CT: control target
= control target key end

     0   :  { %s5351_s0 = inlined_call_operand.vmem [shape: f32[2,16,64], index: 0, kind: input, shape index: {}]   ;;  %s5352_s1 = inlined_call_operand.vmem [shape: f32[2,2,64], index: 1, kind: input, shape index: {}]   ;;  %s5353_s2 = inlined_call_operand.hbm [shape: f32[64,64], index: 2, kind: input, shape index: {}]   ;;  %s5354_s3 = inlined_call_operand.vmem [shape: f32[2,8,32], index: 3, kind: input, shape index: {}]   ;;  %s5355_s4 = inlined_call_operand.vmem [shape: f32[2,2,32], index: 4, kind: input, shape index: {}]   ;;  %s5356_s5 = inlined_call_operand.hbm [shape: f32[32,32], index: 5, kind: input, shape index: {}]   ;;  %s5357_s6 = inlined_call_operand.vmem [shape: f32[16,8], index: 6, kind: input, shape index: {}]   ;;  %s5358_s7 = inlined_call_operand.hbm [shape: f32[32,64], index: 7, kind: input, shape index: {}]   ;;  %s5359_s8 = inlined_call_operand.hbm [shape: bf16[192,128], index: 8, kind: input, shape index: {}]   ;;  %s5360_s9 = inlined_call_operand.hbm [shape: bf16[192,128], index: 9, kind: input, shape index: {}]   ;;  %s5361_s10 = inlined_call_operand.vmem [shape: f32[1,128], index: 10, kind: input, shape index: {}]   ;;  %s5362_s11 = inlined_call_operand.vmem [shape: f32[128,128], index: 11, kind: input, shape index: {}]   ;;  %s5363_s12 = inlined_call_operand.vmem [shape: f32[2,2,128], index: 12, kind: input, shape index: {}]   ;;  %s5364_s13 = inlined_call_operand.vmem [shape: bf16[384,128], index: 13, kind: input, shape index: {}]   ;;  %s5365_s14 = inlined_call_operand.vmem [shape: f32[2,2,128], index: 14, kind: input, shape index: {}]   ;;  %s5366_s15 = inlined_call_operand.vmem [shape: bf16[384,128], index: 15, kind: input, shape index: {}]   ;;  %s5367_s16 = inlined_call_operand.vmem [shape: f32[2,16,128], index: 16, kind: output, shape index: {}]  }
   0x1   :  { %5370 = sst [smem:[#allocation13_spill]] %s5351_s0 }
   0x2   :  { %5371 = sst [smem:[#allocation14_spill]] %s5356_s5 }
   0x3   :  { %21 = vsyncpa [#allocation3], 0 }
   0x4   :  { %22 = vsyncpa [#allocation5], 0 }
   0x5   :  { %23 = vsyncpa [#allocation8], 0  ;;  %s4605_s21 = smov 0  }
   0x6 LB: > { %s4611_s22 = sadd.s32 4294967295, %s4507_s21   ;;  %p3468_p0 = scmp.ge.s32.totalorder %s4507_s21, 1  ;;  %s4507_s21 = sphi %s4605_s21, %s29_s21  }
   0x7   : > { %p426_p1 = scmp.lt.s32.totalorder %s4507_s21, 3  ;;  %p4250_p2 = scmp.eq.s32.totalorder %s4611_s22, 0 }
   0x8   : > { %s4509_s24 = smov [#allocation4]   ;;  %s4510_s26 = smov [#allocation7]  }
   0x9   : > { %p4616_p3 = pnand %p3468_p0, %p426_p1  ;;  %s451_s25 = sshll.u32 %s4509_s24, 4  ;;  %s452_s25 = int_to_ptr.vmem [resolvable:$true] %s451_s25 }
   0xa   : > { %s480_s27 = sshll.u32 %s4510_s26, 4  ;;  %s4511_s29 = smov [#allocation2]   ;;  %s4622_s27 = int_to_ptr.vmem [resolvable:$true] %s480_s27 }
   0xb   : > { %p4234_p4 = pneg %p4616_p3  ;;  %s4630_s30 = sshll.u32 %s4511_s29, 4  ;;  %s439_s30 = int_to_ptr.vmem [resolvable:$true] %s4630_s30 }
   0xc   : > { %s4370_s17 = scalar_lea.vmem %s452_s25, 512  ;;  %p4378_p10 = scmp.lt.s32.totalorder %s452_s25, %s452_s25 }
   0xd   : > { %p4626_p5 = pnand %p4250_p2, %p4234_p4  ;;  %p4371_p7 = scmp.ne.s32.totalorder %s452_s25, %s4370_s17 }
   0xe   : > { %p4379_p11 = scmp.lt.s32.totalorder %s4370_s17, %s4370_s17 }
   0xf   : > { %p4634_p6 = pneg %p4626_p5 }
  0x10   : > { %p4380_p12 = por %p4379_p11, %p4378_p10 }
  0x11   : > { %p4373_p8 = pnand %p4371_p7, %p4634_p6 }
  0x13   : > { %p4374_p9 = pneg %p4373_p8 }
  0x15   : > { %p4381_p13 = pnand %p4380_p12, %p4374_p9 }
  0x17   : > { %4384 = shalt.err (!%p4381_p13)
}
  0x18   : > { %s5368_s18 = smov 128   ;;  %s4513_s19 = smov 8  }
  0x19   : > { %s5375_s5 = sld [smem:[#allocation14_spill]]  ;;  %s4396_s26 = scalar_lea.vmem %s4622_s27, 1536 }
  0x1a   : > { %p4397_p0 = scmp.ne.s32.totalorder %s4622_s27, %s4396_s26  ;;  %p4404_p7 = scmp.lt.s32.totalorder %s4622_s27, %s4622_s27 }
  0x1b   : > { %p4405_p8 = scmp.lt.s32.totalorder %s4396_s26, %s4396_s26 }
  0x1c   : > { %p4399_p1 = pnand %p4397_p0, %p4634_p6 }
  0x1d   : > { %p4406_p9 = por %p4405_p8, %p4404_p7 }
  0x1e   : > { %p4400_p4 = pneg %p4399_p1 }
  0x1f   : > { %4240 = dma.hbm_to_vmem [thread:$0]  (!%p4626_p5), %s5375_s5, 512, %s452_s25, [#allocation5], %s5368_s18, %s5368_s18, %s4513_s19  }
  0x20   : > { %p4407_p10 = pnand %p4406_p9, %p4400_p4 }
  0x22   : > { %4410 = shalt.err (!%p4407_p10)
}
  0x23   : > { %s4514_s29 = smov 64   ;;  %s4515_s17 = smov 4  }
  0x24   : > { %4246 = dma.hbm_to_vmem [thread:$0]  (!%p4626_p5), %s5359_s8, 1536, %s4622_s27, [#allocation8], %s4514_s29, %s4514_s29, %s4515_s17  }
  0x25   : > { %s4516_s24 = smov [#allocation6]   ;;  %s4422_s18 = scalar_lea.vmem %s439_s30, 1024 }
  0x26   : > { %s467_s26 = sshll.u32 %s4516_s24, 4  ;;  %p4423_p11 = scmp.ne.s32.totalorder %s439_s30, %s4422_s18  ;;  %s468_s26 = int_to_ptr.vmem [resolvable:$true] %s467_s26 }
  0x27   : > { %p4430_p0 = scmp.lt.s32.totalorder %s439_s30, %s439_s30  ;;  %p4431_p1 = scmp.lt.s32.totalorder %s4422_s18, %s4422_s18 }
  0x28   : > { %p4425_p12 = pnand %p4423_p11, %p4634_p6 }
  0x29   : > { %p4432_p4 = por %p4431_p1, %p4430_p0 }
  0x2a   : > { %p4426_p13 = pneg %p4425_p12 }
  0x2c   : > { %p4433_p7 = pnand %p4432_p4, %p4426_p13 }
  0x2e   : > { %4436 = shalt.err (!%p4433_p7)
}
  0x2f   : > { %s5376_s5 = smov 128   ;;  %s4448_s20 = scalar_lea.vmem %s468_s26, 512 }
  0x30   : > { %4237 = dma.hbm_to_vmem [thread:$0]  (!%p4626_p5), %s5353_s2, 1024, %s439_s30, [#allocation3], %s5376_s5, %s5376_s5, %s4513_s19  }
  0x31   : > { %p4449_p8 = scmp.ne.s32.totalorder %s468_s26, %s4448_s20  ;;  %p4456_p11 = scmp.lt.s32.totalorder %s468_s26, %s468_s26 }
  0x32   : > { %p4457_p12 = scmp.lt.s32.totalorder %s4448_s20, %s4448_s20 }
  0x33   : > { %p4451_p9 = pnand %p4449_p8, %p4634_p6 }
  0x34   : > { %p4458_p13 = por %p4457_p12, %p4456_p11 }
  0x35   : > { %p4452_p10 = pneg %p4451_p9 }
  0x37   : > { %p4459_p0 = pnand %p4458_p13, %p4452_p10 }
  0x39   : > { %4462 = shalt.err (!%p4459_p0)
}
  0x3a   : > { %4243 = dma.hbm_to_vmem [thread:$0]  (!%p4626_p5), %s5358_s7, 512, %s468_s26, [#allocation5], %s5376_s5, %s5376_s5, %s4513_s19  }
  0x3b   : > { %s4517_s30 = smov [#allocation9]  }
  0x3c   : > { %s493_s25 = sshll.u32 %s4517_s30, 4  ;;  %s494_s25 = int_to_ptr.vmem [resolvable:$true] %s493_s25 }
  0x3d   : > { %s4474_s27 = scalar_lea.vmem %s494_s25, 1536  ;;  %p4482_p8 = scmp.lt.s32.totalorder %s494_s25, %s494_s25 }
  0x3e   : > { %p4475_p1 = scmp.ne.s32.totalorder %s494_s25, %s4474_s27  ;;  %p4483_p9 = scmp.lt.s32.totalorder %s4474_s27, %s4474_s27 }
  0x40   : > { %p4477_p4 = pnand %p4475_p1, %p4634_p6  ;;  %p4484_p10 = por %p4483_p9, %p4482_p8 }
  0x42   : > { %p4478_p7 = pneg %p4477_p4 }
  0x44   : > { %p4485_p11 = pnand %p4484_p10, %p4478_p7 }
  0x46   : > { %4488 = shalt.err (!%p4485_p11)
}
  0x47   : > { %4249 = dma.hbm_to_vmem [thread:$0]  (!%p4626_p5), %s5360_s9, 1536, %s494_s25, [#allocation8], %s4514_s29, %s4514_s29, %s4515_s17  }
  0x48   : > { %564 = sbr.rel (%p4616_p3) target bundleno = 2847 (0xb1f), region = 84 }
  0x4d   : > { %4494 = dma.done.wait (%p4250_p2), [#allocation3], 1024  }
  0x4e   : > { %4496 = vsyncadd (%p4250_p2), [#allocation3], 4294966272 }
  0x4f   : > { %4498 = dma.done.wait (%p4250_p2), [#allocation5], 1024  }
  0x50   : > { %4500 = vsyncadd (%p4250_p2), [#allocation5], 4294966272 }
  0x51   : > { %4502 = dma.done.wait (%p4250_p2), [#allocation8], 3072  }
  0x52   : > { %4504 = vsyncadd (%p4250_p2), [#allocation8], 4294964224  ;;  %p650_p3 = scmp.lt.s32.totalorder %s4611_s22, 1  ;;  %v4518_v0 = vmov 0.0   ;;  %vm4519_vm0 = vmmov 0   ;;  %s5377_s19 = sld [smem:[#allocation13_spill]]  ;;  %v681_v31 = vlaneseq }
  0x53   : > { %3830 = vmatprep.subr.mxu0 %v4518_v0  ;;  %3849 = vmatprep.subr.mxu1 %v4518_v0  ;;  %v733_v1 = vld [vmem:[#allocation2 + $0x38] sm:$0xff]  ;;  %v732_v2 = vld [vmem:[#allocation2 + $0x30] sm:$0xff]  ;;  %vm705_vm1 = vcmask 523264   ;;  %v731_v3 = vld [vmem:[#allocation2 + $0x28] sm:$0xff]  ;;  %vm933_vm3 = vcmask 130048   ;;  %vm1316_vm7 = vcmask 261120  }
  0x54   : > { %3846 = vmatprep.mubr.msk.f32.mxu0 %vm4519_vm0, %v4518_v0  ;;  %s5379_s22 = smov (!%p650_p3, %s4611_s22), 1  ;;  %3865 = vmatprep.mubr.msk.f32.mxu1 %vm4519_vm0, %v4518_v0  ;;  %v730_v8 = vld [vmem:[#allocation2 + $0x20] sm:$0xff]  ;;  %v729_v13 = vld [vmem:[#allocation2 + $0x18] sm:$0xff]  ;;  %v728_v15 = vld [vmem:[#allocation2 + $0x10] sm:$0xff]  ;;  %v682_v32 = vshrl.u32 %v681_v31, 7  ;;  %v685_v34 = vand.u32 127, %v681_v31 }
  0x55   : > { %s3600_s23 = sshll.u32 %s5379_s22, 4  ;;  %3831 = vmatpush3.msra.mxu0 %v733_v1  ;;  %3850 = vmatpush3.msra.mxu1 %v733_v1  ;;  %v727_v18 = vld [vmem:[#allocation2 + $0x8] sm:$0xff]  ;;  %v726_v21 = vld [vmem:[#allocation2] sm:$0xff]  ;;  %s4765_s17 = sshll.u32 %s5379_s22, 1  ;;  %vm1586_vm8 = vcmask 64512  }
  0x56   : > { %3832 = vmatprep.subr.mxu0 %v4518_v0  ;;  %3851 = vmatprep.subr.mxu1 %v4518_v0  ;;  %v683_v33 = vadd.s32 8, %v682_v32  ;;  %v3490_v35 = vadd.s32 4294967295, %v682_v32  ;;  %v694_v37 = vadd.s32 1, %v682_v32  ;;  %v4767_v49 = vsub.s32 0, %v682_v32  ;;  %s658_s24 = scalar_lea.vmem %s5352_s1, %s4765_s17  ;;  %s3484_s30 = sshll.u32 %s5379_s22, 3 }
  0x57   : > { %3833 = vmatpush3.msra.mxu0 %v732_v2  ;;  %3852 = vmatpush3.msra.mxu1 %v732_v2  ;;  %v704_v51 = vld [vmem:[%s658_s24] sm:$0x3]  ;;  %v4774_v52 = vsub.s32 1, %v682_v32  ;;  %s662_s20 = scalar_lea.vmem %s5354_s3, %s3484_s30  ;;  %v1335_v32 = vld [vmem:[#allocation4 + $0x18] sm:$0xff]  ;;  %s666_s0 = scalar_lea.vmem %s5355_s4, %s4765_s17 }
  0x58   : > { %s654_s29 = scalar_lea.vmem %s5377_s19, %s3600_s23  ;;  %3834 = vmatprep.subr.mxu0 %v4518_v0  ;;  %3853 = vmatprep.subr.mxu1 %v4518_v0  ;;  %v3491_v36 = vadd.s32 4294967295, %v683_v33  ;;  %vm688_vm2 = vcmp.eq.s32.totalorder %v685_v34, %v3490_v35  ;;  %v695_v39 = vadd.s32 1, %v683_v33  ;;  %vm696_vm5 = vcmp.eq.s32.totalorder %v685_v34, %v694_v37  ;;  %v1333_v37 = vld [vmem:[#allocation4 + $0x8] sm:$0xff]  ;;  %s670_s24 = scalar_lea.vmem %s5363_s12, %s4765_s17 }
  0x59   : > { %v4726_v4 = vld [vmem:[%s654_s29] sm:$0xff]  ;;  %v4728_v5 = vld [vmem:[%s654_s29 + $0x8] sm:$0xff]  ;;  %3835 = vmatpush3.msra.mxu0 %v731_v3  ;;  %3854 = vmatpush3.msra.mxu1 %v731_v3  ;;  %v4755_v38 = vsel %vm688_vm2, 1.0, %v4518_v0  ;;  %v4760_v40 = vsel %vm696_vm5, 1.0, %v4518_v0  ;;  %v900_v57 = vrot.slane %v704_v51, %v4767_v49  ;;  %v906_v59 = vrot.slane %v704_v51, %v4774_v52  ;;  %v4279_v3 = vld [vmem:[#allocation7 + $0x38] sm:$0xff]  }
  0x5a   : > { %v706_v6 = vsel %vm705_vm1, %v4726_v4, 0.0  ;;  %v715_v7 = vmul.f32 %v4726_v4, %v4726_v4  ;;  %v707_v9 = vsel %vm705_vm1, %v4728_v5, 0.0  ;;  %v716_v10 = vmul.f32 %v4728_v5, %v4728_v5  ;;  %3836 = vmatprep.subr.mxu0 %v4518_v0  ;;  %3855 = vmatprep.subr.mxu1 %v4518_v0  ;;  %v1509_v51 = vld [vmem:[#allocation6 + $0x10] sm:$0xff] }
  0x5b   : > { %v708_v11 = vadd.f32 %v707_v9, %v706_v6  ;;  %3837 = vmatpush3.msra.mxu0 %v730_v8  ;;  %3856 = vmatpush3.msra.mxu1 %v730_v8  ;;  %vm689_vm4 = vcmp.eq.s32.totalorder %v685_v34, %v3491_v36  ;;  %vm697_vm6 = vcmp.eq.s32.totalorder %v685_v34, %v695_v39  ;;  %v4280_v6 = vld [vmem:[#allocation7 + $0x30] sm:$0xff]   ;;  %v4281_v8 = vld [vmem:[#allocation7 + $0x28] sm:$0xff]   ;;  %v1332_v39 = vld [vmem:[#allocation4] sm:$0xff] }
  0x5c   : > { %v717_v12 = vsel %vm705_vm1, %v715_v7, 0.0  ;;  %v718_v14 = vsel %vm705_vm1, %v716_v10, 0.0  ;;  %3838 = vmatprep.subr.mxu0 %v4518_v0  ;;  %3857 = vmatprep.subr.mxu1 %v4518_v0  ;;  %v4783_v2 = vsel %vm689_vm4, 1.0, %v4518_v0  ;;  %v4285_v7 = vld [vmem:[#allocation7 + $0x10] sm:$0xff]   ;;  %v4287_v9 = vld [vmem:[#allocation7 + $0x8] sm:$0xff]   ;;  %v4282_v10 = vld [vmem:[#allocation7 + $0x20] sm:$0xff]  }
  0x5d   : > { %v709_v16 = vrot.slane %v708_v11, 4  ;;  %v719_v17 = vadd.f32 %v718_v14, %v717_v12  ;;  %3839 = vmatpush3.msra.mxu0 %v729_v13  ;;  %3858 = vmatpush3.msra.mxu1 %v729_v13  ;;  %v4286_v13 = vld [vmem:[#allocation7 + $0x50] sm:$0xff]   ;;  %v4288_v14 = vld [vmem:[#allocation7 + $0x48] sm:$0xff]  }
  0x5e   : > { %3840 = vmatprep.subr.mxu0 %v4518_v0  ;;  %3859 = vmatprep.subr.mxu1 %v4518_v0  ;;  %v1334_v34 = vld [vmem:[#allocation4 + $0x10] sm:$0xff] }
  0x5f   : > { %v710_v19 = vadd.f32 %v709_v16, %v708_v11  ;;  %v720_v20 = vrot.slane %v719_v17, 4  ;;  %3841 = vmatpush3.msra.mxu0 %v728_v15  ;;  %3860 = vmatpush3.msra.mxu1 %v728_v15  ;;  %v4284_v11 = vld [vmem:[#allocation7 + $0x58] sm:$0xff]   ;;  %v4289_v15 = vld [vmem:[#allocation7] sm:$0xff]  }
  0x60   : > { %3842 = vmatprep.subr.mxu0 %v4518_v0  ;;  %3861 = vmatprep.subr.mxu1 %v4518_v0  ;;  %v4290_v16 = vld [vmem:[#allocation7 + $0x40] sm:$0xff]  }
  0x61   : > { %v711_v22 = vrot.slane %v710_v19, 2  ;;  %v721_v23 = vadd.f32 %v720_v20, %v719_v17  ;;  %3843 = vmatpush3.msra.mxu0 %v727_v18  ;;  %3862 = vmatpush3.msra.mxu1 %v727_v18  ;;  %v4818_v17 = vld [vmem:[%s662_s20] sm:$0xff]  ;;  %s679_s20 = scalar_lea.vmem %s5367_s16, %s3600_s23 }
  0x62   : > { %3844 = vmatprep.subr.mxu0 %v4518_v0  ;;  %3863 = vmatprep.subr.mxu1 %v4518_v0  ;;  %v1317_v18 = vsel %vm1316_vm7, %v4818_v17, 0.0  ;;  %v1324_v20 = vmul.f32 %v4818_v17, %v4818_v17 }
  0x63   : > { %v712_v24 = vadd.f32 %v711_v22, %v710_v19  ;;  %v722_v25 = vrot.slane %v721_v23, 2  ;;  %3845 = vmatpush3.msra.mxu0 %v726_v21  ;;  %3864 = vmatpush3.msra.mxu1 %v726_v21  ;;  %v1318_v19 = vrot.slane %v1317_v18, 4 }
  0x64   : > { %v1325_v22 = vsel %vm1316_vm7, %v1324_v20, 0.0 }
  0x65   : > { %v713_v26 = vrot.slane %v712_v24, 1  ;;  %v723_v27 = vadd.f32 %v722_v25, %v721_v23  ;;  %v1319_v21 = vadd.f32 %v1318_v19, %v1317_v18 }
  0x67   : > { %v714_v28 = vadd.f32 %v713_v26, %v712_v24  ;;  %v724_v29 = vrot.slane %v723_v27, 1  ;;  %v1320_v23 = vrot.slane %v1319_v21, 2  ;;  %v1326_v24 = vrot.slane %v1325_v22, 4 }
  0x69   : > { %3847 = vmatmul.mubr.msk.f32.vlgmr.msra.gmra.mxu0 %vm705_vm1, %v714_v28  ;;  %v725_v30 = vadd.f32 %v724_v29, %v723_v27  ;;  %v1321_v27 = vadd.f32 %v1320_v23, %v1319_v21  ;;  %v1327_v28 = vadd.f32 %v1326_v24, %v1325_v22 }
  0x6a   : > { %3872 = vmatprep.mubr.msk.f32.mxu0 %vm933_vm3, %v4755_v38 }
  0x6b   : > { %3866 = vmatmul.mubr.msk.f32.vlgmr.msra.gmra.mxu1 %vm705_vm1, %v725_v30  ;;  %v1322_v35 = vrot.slane %v1321_v27, 1  ;;  %v1328_v36 = vrot.slane %v1327_v28, 2 }
  0x6c   : > { %3879 = vmatprep.mubr.msk.f32.mxu1 %vm933_vm3, %v4760_v40 }
 0x129   : > { %v803_v41 = vpop.f32.mrf.mxu0 }
 0x12a   : > { %v880_v42 = vmul.f32 %v803_v41, %v803_v41  ;;  %v888_v50 = vrot.slane %v803_v41, %v4767_v49  ;;  %v1323_v41 = vadd.f32 %v1322_v35, %v1321_v27  ;;  %v4299_v35 = vld [vmem:[#allocation9 + $0x8] sm:$0xff]  }
 0x12b   : > { %v3848_v43 = vpop.f32.mrf.mxu0  ;;  %v876_v44 = vpop.f32.mrf.mxu1 }
 0x12c   : > { %v881_v45 = vsub.f32 %v876_v44, %v880_v42  ;;  %v889_v54 = vsub.f32 %v4726_v4, %v888_v50  ;;  %v890_v55 = vsub.f32 %v4728_v5, %v888_v50  ;;  %v4787_v4 = vsel %vm697_vm6, 1.0, %v4518_v0  ;;  %v4283_v5 = vld [vmem:[#allocation7 + $0x18] sm:$0xff]  }
 0x12d   : > { %v3867_v46 = vpop.f32.mrf.mxu1  ;;  %v1329_v42 = vadd.f32 %v1328_v36, %v1327_v28  ;;  %v1510_v50 = vld [vmem:[#allocation6 + $0x18] sm:$0xff]  ;;  %v4294_v36 = vld [vmem:[#allocation9 + $0x20] sm:$0xff]  }
 0x12e   : > { %v882_v47 = vmax.f32 %v881_v45, 0.0 }
 0x12f   : > { %v1330_v43 = vrot.slane %v1329_v42, 1 }
 0x130   : > { %v883_v48 = vadd.f32 1e-05, %v882_v47 }
 0x131   : > { %v1331_v45 = vadd.f32 %v1330_v43, %v1329_v42  ;;  %v4300_v42 = vld [vmem:[#allocation9 + $0x48] sm:$0xff]   ;;  %v4301_v43 = vld [vmem:[#allocation9] sm:$0xff]  }
 0x132   : > { %4351 = vrsqrt.f32 %v883_v48 }
 0x13f   : > { %v4352_v53 = vpop.eup %4351 }
 0x140   : > { %v894_v56 = vrot.slane %v4352_v53, %v4767_v49  ;;  %v1508_v53 = vld [vmem:[#allocation6 + $0x8] sm:$0xff] }
 0x142   : > { %v896_v58 = vmul.f32 %v894_v56, %v890_v55  ;;  %v895_v60 = vmul.f32 %v894_v56, %v889_v54  ;;  %v1507_v54 = vld [vmem:[#allocation6] sm:$0xff] }
 0x144   : > { %v902_v61 = vmul.f32 %v900_v57, %v896_v58  ;;  %v901_v62 = vmul.f32 %v900_v57, %v895_v60 }
 0x146   : > { %v908_v63 = vadd.f32 %v906_v59, %v902_v61  ;;  %v907_v1 = vadd.f32 %v906_v59, %v901_v62 }
 0x148   : > { %3868 = vmatprep.subr.mxu0 %v908_v63  ;;  %3875 = vmatprep.subr.mxu1 %v908_v63  ;;  %v1097_v12 = vpack.c.bf16 %v908_v63, %v907_v1 }
 0x149   : > { %3869 = vmatpush3.msra.mxu0 %v908_v63  ;;  %3876 = vmatpush3.msra.mxu1 %v908_v63 }
 0x14a   : > { %3870 = vmatprep.subr.mxu0 %v907_v1  ;;  %3877 = vmatprep.subr.mxu1 %v907_v1 }
 0x14b   : > { %3871 = vmatpush3.msra.mxu0 %v907_v1  ;;  %3878 = vmatpush3.msra.mxu1 %v907_v1 }
 0x14c   : > { %3873 = vmatmul.mubr.msk.f32.vlgmr.msra.gmra.mxu0 %vm933_vm3, %v4783_v2  ;;  %3882 = vmatprep.subr.bf16.mxu0 %v4518_v0 }
 0x14d   : > { %3883 = vmatpush3.bf16.msra.mxu0 %v4279_v3  ;;  %3880 = vmatmul.mubr.msk.f32.vlgmr.msra.gmra.mxu1 %vm933_vm3, %v4787_v4 }
 0x14e   : > { %3884 = vmatprep.subr.bf16.mxu0 %v4518_v0  ;;  %3890 = vmatprep.mubr.msk.bf16.mxu0 %vm4519_vm0, %v4518_v0 }
 0x14f   : > { %3894 = vmatprep.subr.bf16.mxu1 %v4518_v0  ;;  %3902 = vmatprep.mubr.msk.bf16.mxu1 %vm4519_vm0, %v4518_v0 }
 0x150   : > { %3895 = vmatpush3.bf16.msra.mxu1 %v4283_v5 }
 0x151   : > { %3885 = vmatpush3.bf16.msra.mxu0 %v4280_v6  ;;  %3896 = vmatprep.subr.bf16.mxu1 %v4518_v0 }
 0x152   : > { %3886 = vmatprep.subr.bf16.mxu0 %v4518_v0 }
 0x154   : > { %3897 = vmatpush3.bf16.msra.mxu1 %v4285_v7 }
 0x155   : > { %3887 = vmatpush3.bf16.msra.mxu0 %v4281_v8  ;;  %3898 = vmatprep.subr.bf16.mxu1 %v4518_v0 }
 0x156   : > { %3888 = vmatprep.subr.bf16.mxu0 %v4518_v0 }
 0x158   : > { %3899 = vmatpush3.bf16.msra.mxu1 %v4287_v9 }
 0x159   : > { %3889 = vmatpush3.bf16.msra.mxu0 %v4282_v10  ;;  %3900 = vmatprep.subr.bf16.mxu1 %v4518_v0 }
 0x15a   : > { %3906 = vmatprep.subr.bf16.mxu0 %v4518_v0 }
 0x15c   : > { %3891 = vmatmul.mubr.msk.bf16.vlgmr.msra.gmra.mxu0 %vm705_vm1, %v1097_v12  ;;  %3901 = vmatpush3.bf16.msra.mxu1 %v4289_v15  ;;  %v1315_v15 = vld [vmem:[%s666_s0] sm:$0x3]  ;;  %s674_s0 = scalar_lea.vmem %s5365_s14, %s4765_s17 }
 0x15d   : > { %3907 = vmatpush3.bf16.msra.mxu0 %v4284_v11  ;;  %3914 = vmatprep.mubr.msk.bf16.mxu0 %vm4519_vm0, %v4518_v0  ;;  %v1500_v20 = vrot.slane %v1315_v15, %v4767_v49  ;;  %v1505_v22 = vrot.slane %v1315_v15, %v4774_v52 }
 0x15e   : > { %3908 = vmatprep.subr.bf16.mxu0 %v4518_v0  ;;  %3918 = vmatprep.subr.mxu1 %v4518_v0 }
 0x161   : > { %3909 = vmatpush3.bf16.msra.mxu0 %v4286_v13 }
 0x162   : > { %3910 = vmatprep.subr.bf16.mxu0 %v4518_v0 }
 0x165   : > { %3911 = vmatpush3.bf16.msra.mxu0 %v4288_v14 }
 0x166   : > { %3912 = vmatprep.subr.bf16.mxu0 %v4518_v0 }
 0x169   : > { %3913 = vmatpush3.bf16.msra.mxu0 %v4290_v16 }
 0x16a   : > { %3940 = vmatprep.subr.mxu0 %v4518_v0 }
 0x20c   : > { %v3874_v25 = vpop.f32.mrf.mxu0 }
 0x20d   : > { %v3881_v26 = vpop.f32.mrf.mxu1 }
 0x20e   : > { %v1006_v29 = vpop.f32.mrf.mxu0 }
 0x20f   : > { %v1096_v30 = vpack.c.bf16 %v3874_v25, %v1006_v29  ;;  %v1087_v31 = vpop.f32.mrf.mxu1  ;;  %v1584_v25 = vld [vmem:[%s5357_s6] sm:$0xff] }
 0x210   : > { %v1234_v33 = vpack.c.bf16 %v3881_v26, %v1087_v31  ;;  %v1585_v26 = vld [vmem:[%s5357_s6 + $0x8] sm:$0xff]  ;;  %v4295_v31 = vld [vmem:[#allocation9 + $0x18] sm:$0xff]  }
 0x211   : > { %3903 = vmatmul.mubr.msk.bf16.vlgmr.msra.gmra.mxu1 %vm705_vm1, %v1096_v30  ;;  %v4291_v30 = vld [vmem:[#allocation9 + $0x38] sm:$0xff]  }
 0x212   : > { %3919 = vmatpush3.msra.mxu1 %v1335_v32  ;;  %3915 = vmatmul.mubr.msk.bf16.vlgmr.msra.gmra.mxu0 %vm705_vm1, %v1234_v33  ;;  %v4297_v33 = vld [vmem:[#allocation9 + $0x10] sm:$0xff]  }
 0x213   : > { %3920 = vmatprep.subr.mxu1 %v4518_v0  ;;  %3926 = vmatprep.mubr.msk.f32.mxu1 %vm4519_vm0, %v4518_v0 }
 0x214   : > { %3921 = vmatpush3.msra.mxu1 %v1334_v34  ;;  %3948 = vmatprep.mubr.msk.f32.mxu0 %vm4519_vm0, %v4518_v0 }
 0x215   : > { %3922 = vmatprep.subr.mxu1 %v4518_v0  ;;  %3941 = vmatpush3.msra.mxu0 %v1510_v50 }
 0x216   : > { %3923 = vmatpush3.msra.mxu1 %v1333_v37  ;;  %3942 = vmatprep.subr.mxu0 %v4518_v0 }
 0x217   : > { %3924 = vmatprep.subr.mxu1 %v4518_v0  ;;  %3943 = vmatpush3.msra.mxu0 %v1509_v51 }
 0x218   : > { %3925 = vmatpush3.msra.mxu1 %v1332_v39  ;;  %3944 = vmatprep.subr.mxu0 %v4518_v0 }
 0x219   : > { %3929 = vmatprep.subr.mxu1 %v4518_v0  ;;  %3927 = vmatmul.mubr.msk.f32.vlgmr.msra.gmra.mxu1 %vm1316_vm7, %v1323_v41  ;;  %v4298_v41 = vld [vmem:[#allocation9 + $0x50] sm:$0xff]  }
 0x21a   : > { %3930 = vmatpush3.msra.mxu1 %v1335_v32  ;;  %3937 = vmatprep.mubr.msk.f32.mxu1 %vm4519_vm0, %v4518_v0  ;;  %v4292_v32 = vld [vmem:[#allocation9 + $0x30] sm:$0xff]  }
 0x21b   : > { %3931 = vmatprep.subr.mxu1 %v4518_v0  ;;  %3945 = vmatpush3.msra.mxu0 %v1508_v53  ;;  %v4897_v53 = vld [vmem:[%s5362_s11 + $0x78] sm:$0xff] }
 0x21c   : > { %3932 = vmatpush3.msra.mxu1 %v1334_v34  ;;  %v1159_v44 = vpop.f32.mrf.mxu0  ;;  %3946 = vmatprep.subr.mxu0 %v4518_v0  ;;  %v4293_v34 = vld [vmem:[#allocation9 + $0x28] sm:$0xff]  }
 0x21d   : > { %3933 = vmatprep.subr.mxu1 %v4518_v0  ;;  %3947 = vmatpush3.msra.mxu0 %v1507_v54  ;;  %v4904_v54 = vld [vmem:[%s5362_s11 + $0x70] sm:$0xff] }
 0x21e   : > { %3934 = vmatpush3.msra.mxu1 %v1333_v37  ;;  %v3892_v46 = vpop.f32.mrf.mxu0  ;;  %v4296_v37 = vld [vmem:[#allocation9 + $0x58] sm:$0xff]  }
 0x21f   : > { %3935 = vmatprep.subr.mxu1 %v4518_v0 }
 0x220   : > { %3936 = vmatpush3.msra.mxu1 %v1332_v39  ;;  %v1162_v47 = vpop.f32.mrf.mxu0 }
 0x221   : > { %3938 = vmatmul.mubr.msk.f32.vlgmr.msra.gmra.mxu1 %vm1316_vm7, %v1331_v45 }
 0x222   : > { %v3893_v48 = vpop.f32.mrf.mxu0  ;;  %3953 = vmatprep.mubr.msk.f32.mxu1 %vm1586_vm8, %v1584_v25 }
 0x2d1   : > { %v1227_v55 = vpop.f32.mrf.mxu1 }
 0x2d2   : > { %v1228_v56 = vadd.f32 %v1227_v55, %v1159_v44  ;;  %v1296_v57 = vpop.f32.mrf.mxu0  ;;  %v4302_v44 = vld [vmem:[#allocation9 + $0x40] sm:$0xff]   ;;  %v4913_v55 = vld [vmem:[%s5362_s11 + $0x68] sm:$0xff] }
 0x2d3   : > { %v3904_v58 = vpop.f32.mrf.mxu1 }
 0x2d4   : > { %v4845_v59 = vadd.f32 %v1296_v57, %v1228_v56  ;;  %v3916_v60 = vpop.f32.mrf.mxu0 }
 0x2d5   : > { %v1230_v61 = vpop.f32.mrf.mxu1 }
 0x2d6   : > { %v1231_v62 = vadd.f32 %v1230_v61, %v1162_v47  ;;  %v1299_v63 = vpop.f32.mrf.mxu0  ;;  %v4934_v61 = vld [vmem:[%s5362_s11 + $0x60] sm:$0xff] }
 0x2d7   : > { %v3905_v1 = vpop.f32.mrf.mxu1 }
 0x2d8   : > { %v4847_v3 = vadd.f32 %v1299_v63, %v1231_v62  ;;  %v3917_v5 = vpop.f32.mrf.mxu0  ;;  %v4942_v62 = vld [vmem:[%s5362_s11 + $0x58] sm:$0xff]  ;;  %v4951_v63 = vld [vmem:[%s5362_s11 + $0x50] sm:$0xff]  ;;  %v4960_v1 = vld [vmem:[%s5362_s11 + $0x48] sm:$0xff] }
 0x2d9   : > { %v1405_v6 = vpop.f32.mrf.mxu1  ;;  %v4969_v5 = vld [vmem:[%s5362_s11 + $0x40] sm:$0xff] }
 0x2da   : > { %v1482_v8 = vmul.f32 %v1405_v6, %v1405_v6  ;;  %v1490_v14 = vrot.slane %v1405_v6, %v4767_v49  ;;  %v4978_v6 = vld [vmem:[%s5362_s11 + $0x38] sm:$0xff] }
 0x2db   : > { %v3928_v7 = vpop.f32.mrf.mxu1 }
 0x2dc   : > { %v1491_v18 = vsub.f32 %v4818_v17, %v1490_v14  ;;  %v4987_v7 = vld [vmem:[%s5362_s11 + $0x30] sm:$0xff] }
 0x2e1   : > { %v1478_v9 = vpop.f32.mrf.mxu1 }
 0x2e2   : > { %v1483_v10 = vsub.f32 %v1478_v9, %v1482_v8  ;;  %v4994_v8 = vld [vmem:[%s5362_s11 + $0x28] sm:$0xff]  ;;  %v5002_v9 = vld [vmem:[%s5362_s11 + $0x20] sm:$0xff] }
 0x2e3   : > { %v3939_v11 = vpop.f32.mrf.mxu1 }
 0x2e4   : > { %v1484_v12 = vmax.f32 %v1483_v10, 0.0  ;;  %v5011_v10 = vld [vmem:[%s5362_s11 + $0x18] sm:$0xff]  ;;  %v5020_v11 = vld [vmem:[%s5362_s11 + $0x10] sm:$0xff] }
 0x2e6   : > { %v1485_v13 = vadd.f32 1e-05, %v1484_v12  ;;  %v5029_v12 = vld [vmem:[%s5362_s11 + $0x8] sm:$0xff] }
 0x2e8   : > { %4353 = vrsqrt.f32 %v1485_v13  ;;  %v5038_v13 = vld [vmem:[%s5362_s11] sm:$0xff] }
 0x2f5   : > { %v4354_v16 = vpop.eup %4353 }
 0x2f6   : > { %v1495_v19 = vrot.slane %v4354_v16, %v4767_v49 }
 0x2f8   : > { %v1496_v21 = vmul.f32 %v1495_v19, %v1491_v18  ;;  %v3517_v18 = vld [vmem:[%s5361_s10] ss:$0 sm:$0xff] }
 0x2fa   : > { %v1501_v23 = vmul.f32 %v1500_v20, %v1496_v21 }
 0x2fc   : > { %v1506_v24 = vadd.f32 %v1505_v22, %v1501_v23 }
 0x2fe   : > { %3949 = vmatmul.mubr.msk.f32.vlgmr.msra.gmra.mxu0 %vm1316_vm7, %v1506_v24  ;;  %v1312_v24 = vadd.f32 %v3517_v18, %v4845_v59 }
 0x2ff   : > { %3967 = vmatprep.mubr.msk.f32.mxu0 %vm933_vm3, %v4760_v40 }
 0x3be   : > { %v1580_v17 = vpop.f32.mrf.mxu0 }
 0x3bf   : > { %3951 = vmatprep.subr.mxu1 %v1580_v17 }
 0x3c0   : > { %v3950_v27 = vpop.f32.mrf.mxu0  ;;  %3952 = vmatpush3.msra.mxu1 %v1580_v17 }
 0x3c1   : > { %3954 = vmatmul.mubr.msk.f32.vlgmr.msra.gmra.mxu1 %vm1586_vm8, %v1585_v26  ;;  %v1313_v27 = vadd.f32 %v3517_v18, %v4847_v3 }
 0x3c2   : > { %3960 = vmatprep.mubr.msk.f32.mxu1 %vm933_vm3, %v4755_v38 }
 0x481   : > { %v3955_v28 = vpop.f32.mrf.mxu1 }
 0x482   : > { %3956 = vmatprep.subr.mxu1 %v3955_v28  ;;  %3963 = vmatprep.subr.mxu0 %v3955_v28 }
 0x483   : > { %v1659_v29 = vpop.f32.mrf.mxu1  ;;  %3957 = vmatpush3.msra.mxu1 %v3955_v28  ;;  %3964 = vmatpush3.msra.mxu0 %v3955_v28 }
 0x484   : > { %3958 = vmatprep.subr.mxu1 %v1659_v29  ;;  %3965 = vmatprep.subr.mxu0 %v1659_v29  ;;  %v1843_v39 = vpack.c.bf16 %v3955_v28, %v1659_v29 }
 0x485   : > { %3959 = vmatpush3.msra.mxu1 %v1659_v29  ;;  %3966 = vmatpush3.msra.mxu0 %v1659_v29 }
 0x486   : > { %3961 = vmatmul.mubr.msk.f32.vlgmr.msra.gmra.mxu1 %vm933_vm3, %v4783_v2  ;;  %3968 = vmatmul.mubr.msk.f32.vlgmr.msra.gmra.mxu0 %vm933_vm3, %v4787_v4 }
 0x487   : > { %3970 = vmatprep.subr.bf16.mxu1 %v4518_v0  ;;  %3978 = vmatprep.mubr.msk.bf16.mxu1 %vm4519_vm0, %v4518_v0 }
 0x488   : > { %3971 = vmatpush3.bf16.msra.mxu1 %v4291_v30  ;;  %3982 = vmatprep.subr.bf16.mxu0 %v4518_v0 }
 0x489   : > { %3972 = vmatprep.subr.bf16.mxu1 %v4518_v0  ;;  %3983 = vmatpush3.bf16.msra.mxu0 %v4295_v31 }
 0x48a   : > { %3984 = vmatprep.subr.bf16.mxu0 %v4518_v0  ;;  %3990 = vmatprep.mubr.msk.bf16.mxu0 %vm4519_vm0, %v4518_v0 }
 0x48c   : > { %3973 = vmatpush3.bf16.msra.mxu1 %v4292_v32 }
 0x48d   : > { %3974 = vmatprep.subr.bf16.mxu1 %v4518_v0  ;;  %3985 = vmatpush3.bf16.msra.mxu0 %v4297_v33 }
 0x48e   : > { %3986 = vmatprep.subr.bf16.mxu0 %v4518_v0 }
 0x490   : > { %3975 = vmatpush3.bf16.msra.mxu1 %v4293_v34 }
 0x491   : > { %3976 = vmatprep.subr.bf16.mxu1 %v4518_v0  ;;  %3987 = vmatpush3.bf16.msra.mxu0 %v4299_v35 }
 0x492   : > { %3988 = vmatprep.subr.bf16.mxu0 %v4518_v0 }
 0x494   : > { %3977 = vmatpush3.bf16.msra.mxu1 %v4294_v36 }
 0x495   : > { %3994 = vmatprep.subr.bf16.mxu1 %v4518_v0  ;;  %3989 = vmatpush3.bf16.msra.mxu0 %v4301_v43 }
 0x496   : > { %4006 = vmatprep.subr.mxu0 %v4518_v0 }
 0x497   : > { %3979 = vmatmul.mubr.msk.bf16.vlgmr.msra.gmra.mxu1 %vm705_vm1, %v1843_v39 }
 0x498   : > { %3995 = vmatpush3.bf16.msra.mxu1 %v4296_v37  ;;  %4002 = vmatprep.mubr.msk.bf16.mxu1 %vm4519_vm0, %v4518_v0 }
 0x499   : > { %3996 = vmatprep.subr.bf16.mxu1 %v4518_v0 }
 0x49c   : > { %3997 = vmatpush3.bf16.msra.mxu1 %v4298_v41 }
 0x49d   : > { %3998 = vmatprep.subr.bf16.mxu1 %v4518_v0 }
 0x4a0   : > { %3999 = vmatpush3.bf16.msra.mxu1 %v4300_v42 }
 0x4a1   : > { %4000 = vmatprep.subr.bf16.mxu1 %v4518_v0 }
 0x4a4   : > { %4001 = vmatpush3.bf16.msra.mxu1 %v4302_v44 }
 0x4a5   : > { %4041 = vmatprep.subr.mxu1 %v4518_v0 }
 0x546   : > { %v3962_v45 = vpop.f32.mrf.mxu1  ;;  %v3969_v46 = vpop.f32.mrf.mxu0 }
 0x548   : > { %v1758_v47 = vpop.f32.mrf.mxu1  ;;  %v1833_v48 = vpop.f32.mrf.mxu0 }
 0x549   : > { %v1842_v50 = vpack.c.bf16 %v3962_v45, %v1758_v47  ;;  %v1980_v51 = vpack.c.bf16 %v3969_v46, %v1833_v48  ;;  %v4307_v47 = vld [vmem:[%s5364_s13 + $0xb8] sm:$0xff]   ;;  %v4310_v48 = vld [vmem:[%s5364_s13 + $0xb0] sm:$0xff]  }
 0x54b   : > { %3991 = vmatmul.mubr.msk.bf16.vlgmr.msra.gmra.mxu0 %vm705_vm1, %v1842_v50  ;;  %4003 = vmatmul.mubr.msk.bf16.vlgmr.msra.gmra.mxu1 %vm705_vm1, %v1980_v51  ;;  %v4313_v50 = vld [vmem:[%s5364_s13 + $0xa8] sm:$0xff]   ;;  %v4316_v51 = vld [vmem:[%s5364_s13 + $0xa0] sm:$0xff]  }
 0x54c   : > { %4007 = vmatpush3.msra.mxu0 %v4897_v53  ;;  %4042 = vmatpush3.msra.mxu1 %v4897_v53 }
 0x54d   : > { %4008 = vmatprep.subr.mxu0 %v4518_v0  ;;  %4043 = vmatprep.subr.mxu1 %v4518_v0 }
 0x54e   : > { %4009 = vmatpush3.msra.mxu0 %v4904_v54  ;;  %4044 = vmatpush3.msra.mxu1 %v4904_v54 }
 0x54f   : > { %4010 = vmatprep.subr.mxu0 %v4518_v0  ;;  %4045 = vmatprep.subr.mxu1 %v4518_v0 }
 0x550   : > { %4011 = vmatpush3.msra.mxu0 %v4913_v55  ;;  %4046 = vmatpush3.msra.mxu1 %v4913_v55 }
 0x551   : > { %4012 = vmatprep.subr.mxu0 %v4518_v0  ;;  %4047 = vmatprep.subr.mxu1 %v4518_v0 }
 0x552   : > { %4038 = vmatprep.mubr.msk.f32.mxu0 %vm4519_vm0, %v4518_v0  ;;  %4073 = vmatprep.mubr.msk.f32.mxu1 %vm4519_vm0, %v4518_v0 }
 0x553   : > { %4013 = vmatpush3.msra.mxu0 %v4934_v61  ;;  %4048 = vmatpush3.msra.mxu1 %v4934_v61 }
 0x554   : > { %4014 = vmatprep.subr.mxu0 %v4518_v0  ;;  %4049 = vmatprep.subr.mxu1 %v4518_v0 }
 0x555   : > { %4015 = vmatpush3.msra.mxu0 %v4942_v62  ;;  %4050 = vmatpush3.msra.mxu1 %v4942_v62 }
 0x556   : > { %4016 = vmatprep.subr.mxu0 %v4518_v0  ;;  %4051 = vmatprep.subr.mxu1 %v4518_v0 }
 0x557   : > { %v4927_v56 = vpop.f32.mrf.mxu1  ;;  %4017 = vmatpush3.msra.mxu0 %v4951_v63  ;;  %4052 = vmatpush3.msra.mxu1 %v4951_v63 }
 0x558   : > { %4018 = vmatprep.subr.mxu0 %v4518_v0  ;;  %4053 = vmatprep.subr.mxu1 %v4518_v0 }
 0x559   : > { %v3980_v57 = vpop.f32.mrf.mxu1  ;;  %4019 = vmatpush3.msra.mxu0 %v4960_v1  ;;  %4054 = vmatpush3.msra.mxu1 %v4960_v1 }
 0x55a   : > { %4020 = vmatprep.subr.mxu0 %v4518_v0  ;;  %4055 = vmatprep.subr.mxu1 %v4518_v0  ;;  %v4322_v57 = vld [vmem:[%s5364_s13 + $0x90] sm:$0xff]  }
 0x55b   : > { %v4929_v58 = vpop.f32.mrf.mxu1  ;;  %4021 = vmatpush3.msra.mxu0 %v4969_v5  ;;  %4056 = vmatpush3.msra.mxu1 %v4969_v5 }
 0x55c   : > { %4022 = vmatprep.subr.mxu0 %v4518_v0  ;;  %4057 = vmatprep.subr.mxu1 %v4518_v0 }
 0x55d   : > { %v3981_v60 = vpop.f32.mrf.mxu1  ;;  %4023 = vmatpush3.msra.mxu0 %v4978_v6  ;;  %4058 = vmatpush3.msra.mxu1 %v4978_v6 }
 0x55e   : > { %4024 = vmatprep.subr.mxu0 %v4518_v0  ;;  %4059 = vmatprep.subr.mxu1 %v4518_v0 }
 0x55f   : > { %4025 = vmatpush3.msra.mxu0 %v4987_v7  ;;  %4060 = vmatpush3.msra.mxu1 %v4987_v7 }
 0x560   : > { %4026 = vmatprep.subr.mxu0 %v4518_v0  ;;  %4061 = vmatprep.subr.mxu1 %v4518_v0 }
 0x561   : > { %4027 = vmatpush3.msra.mxu0 %v4994_v8  ;;  %4062 = vmatpush3.msra.mxu1 %v4994_v8 }
 0x562   : > { %4028 = vmatprep.subr.mxu0 %v4518_v0  ;;  %4063 = vmatprep.subr.mxu1 %v4518_v0 }
 0x563   : > { %4029 = vmatpush3.msra.mxu0 %v5002_v9  ;;  %4064 = vmatpush3.msra.mxu1 %v5002_v9 }
 0x564   : > { %4030 = vmatprep.subr.mxu0 %v4518_v0  ;;  %4065 = vmatprep.subr.mxu1 %v4518_v0 }
 0x565   : > { %4031 = vmatpush3.msra.mxu0 %v5011_v10  ;;  %4066 = vmatpush3.msra.mxu1 %v5011_v10 }
 0x566   : > { %4032 = vmatprep.subr.mxu0 %v4518_v0  ;;  %4067 = vmatprep.subr.mxu1 %v4518_v0 }
 0x567   : > { %4033 = vmatpush3.msra.mxu0 %v5020_v11  ;;  %4068 = vmatpush3.msra.mxu1 %v5020_v11 }
 0x568   : > { %4034 = vmatprep.subr.mxu0 %v4518_v0  ;;  %4069 = vmatprep.subr.mxu1 %v4518_v0 }
 0x569   : > { %4035 = vmatpush3.msra.mxu0 %v5029_v12  ;;  %4070 = vmatpush3.msra.mxu1 %v5029_v12 }
 0x56a   : > { %4036 = vmatprep.subr.mxu0 %v4518_v0  ;;  %4071 = vmatprep.subr.mxu1 %v4518_v0 }
 0x56b   : > { %4037 = vmatpush3.msra.mxu0 %v5038_v13  ;;  %4072 = vmatpush3.msra.mxu1 %v5038_v13 }
 0x56c   : > { %4090 = vmatprep.subr.bf16.mxu1 %v4518_v0 }
 0x60b   : > { %v1973_v14 = vpop.f32.mrf.mxu0  ;;  %v2042_v15 = vpop.f32.mrf.mxu1 }
 0x60c   : > { %v1974_v16 = vadd.f32 %v1973_v14, %v4927_v56  ;;  %v4319_v56 = vld [vmem:[%s5364_s13 + $0x98] sm:$0xff]  }
 0x60d   : > { %v3992_v19 = vpop.f32.mrf.mxu0  ;;  %v4004_v20 = vpop.f32.mrf.mxu1 }
 0x60e   : > { %v2049_v21 = vadd.f32 %v2042_v15, %v1974_v16 }
 0x60f   : > { %v1976_v22 = vpop.f32.mrf.mxu0  ;;  %v2045_v23 = vpop.f32.mrf.mxu1 }
 0x610   : > { %v1977_v25 = vadd.f32 %v1976_v22, %v4929_v58  ;;  %v5054_v28 = vadd.f32 %v2049_v21, %v1312_v24  ;;  %v2053_v22 = vld [vmem:[%s670_s24] sm:$0x3] }
 0x611   : > { %v3993_v17 = vpop.f32.mrf.mxu0  ;;  %v4005_v26 = vpop.f32.mrf.mxu1 }
 0x612   : > { %v2050_v29 = vadd.f32 %v2045_v23, %v1977_v25  ;;  %v2061_v31 = vmul.f32 %v5054_v28, %v5054_v28  ;;  %v2246_v26 = vrot.slane %v2053_v22, %v4767_v49 }
 0x614   : > { %v5056_v30 = vadd.f32 %v2050_v29, %v1313_v27  ;;  %v2252_v29 = vrot.slane %v2053_v22, %v4774_v52 }
 0x616   : > { %v2054_v32 = vadd.f32 %v5056_v30, %v5054_v28  ;;  %v2062_v59 = vmul.f32 %v5056_v30, %v5056_v30 }
 0x618   : > { %v2055_v33 = vrot.slane %v2054_v32, 4  ;;  %v2063_v34 = vadd.f32 %v2062_v59, %v2061_v31 }
 0x61a   : > { %v2056_v35 = vadd.f32 %v2055_v33, %v2054_v32  ;;  %v2064_v36 = vrot.slane %v2063_v34, 4 }
 0x61c   : > { %v2057_v37 = vrot.slane %v2056_v35, 2  ;;  %v2065_v3 = vadd.f32 %v2064_v36, %v2063_v34 }
 0x61e   : > { %v2058_v39 = vadd.f32 %v2057_v37, %v2056_v35  ;;  %v2066_v41 = vrot.slane %v2065_v3, 2  ;;  %v4303_v37 = vld [vmem:[%s5364_s13 + $0x78] sm:$0xff]  }
 0x620   : > { %v2059_v42 = vrot.slane %v2058_v39, 1  ;;  %v2067_v43 = vadd.f32 %v2066_v41, %v2065_v3  ;;  %v4304_v3 = vld [vmem:[%s5364_s13 + $0x38] sm:$0xff]  }
 0x622   : > { %v2060_v44 = vadd.f32 %v2059_v42, %v2058_v39  ;;  %v2068_v45 = vrot.slane %v2067_v43, 1  ;;  %v4305_v39 = vld [vmem:[%s5364_s13 + $0x70] sm:$0xff]  }
 0x623   : > { %v4306_v42 = vld [vmem:[%s5364_s13 + $0x30] sm:$0xff]  }
 0x624   : > { %4039 = vmatmul.mubr.f32.vlgmr.msra.gmra.mxu0 %v2060_v44  ;;  %v2069_v46 = vadd.f32 %v2068_v45, %v2067_v43  ;;  %v4308_v43 = vld [vmem:[%s5364_s13 + $0x68] sm:$0xff]   ;;  %v4311_v45 = vld [vmem:[%s5364_s13 + $0x60] sm:$0xff]  }
 0x625   : > { %4080 = vmatprep.mubr.msk.f32.mxu0 %vm933_vm3, %v4755_v38  ;;  %v4309_v44 = vld [vmem:[%s5364_s13 + $0x28] sm:$0xff]  }
 0x626   : > { %4074 = vmatmul.mubr.f32.vlgmr.msra.gmra.mxu1 %v2069_v46  ;;  %v4312_v46 = vld [vmem:[%s5364_s13 + $0x20] sm:$0xff]  }
 0x627   : > { %4106 = vmatprep.mubr.msk.bf16.mxu1 %vm4519_vm0, %v4518_v0  ;;  %4091 = vmatpush3.bf16.msra.mxu1 %v4307_v47  ;;  %v4314_v47 = vld [vmem:[%s5364_s13 + $0x58] sm:$0xff]  }
 0x628   : > { %4092 = vmatprep.subr.bf16.mxu1 %v4518_v0 }
 0x62b   : > { %4093 = vmatpush3.bf16.msra.mxu1 %v4310_v48  ;;  %v4315_v48 = vld [vmem:[%s5364_s13 + $0x18] sm:$0xff]  }
 0x62c   : > { %4094 = vmatprep.subr.bf16.mxu1 %v4518_v0 }
 0x62f   : > { %4095 = vmatpush3.bf16.msra.mxu1 %v4313_v50  ;;  %v4317_v50 = vld [vmem:[%s5364_s13 + $0x50] sm:$0xff]  }
 0x630   : > { %4096 = vmatprep.subr.bf16.mxu1 %v4518_v0 }
 0x633   : > { %4097 = vmatpush3.bf16.msra.mxu1 %v4316_v51  ;;  %v4318_v51 = vld [vmem:[%s5364_s13 + $0x10] sm:$0xff]  }
 0x634   : > { %4098 = vmatprep.subr.bf16.mxu1 %v4518_v0 }
 0x637   : > { %4099 = vmatpush3.bf16.msra.mxu1 %v4319_v56  ;;  %v4320_v56 = vld [vmem:[%s5364_s13 + $0x48] sm:$0xff]  }
 0x638   : > { %4100 = vmatprep.subr.bf16.mxu1 %v4518_v0 }
 0x63b   : > { %4101 = vmatpush3.bf16.msra.mxu1 %v4322_v57  ;;  %v4321_v57 = vld [vmem:[%s5364_s13 + $0x8] sm:$0xff]  }
 0x63c   : > { %4102 = vmatprep.subr.bf16.mxu1 %v4518_v0 }
 0x6e4   : > { %v2152_v58 = vpop.f32.mrf.mxu0 }
 0x6e5   : > { %v2226_v60 = vmul.f32 %v2152_v58, %v2152_v58  ;;  %v2234_v21 = vrot.slane %v2152_v58, %v4767_v49  ;;  %v4323_v58 = vld [vmem:[%s5364_s13 + $0x40] sm:$0xff]  }
 0x6e6   : > { %v4040_v14 = vpop.f32.mrf.mxu0  ;;  %v2222_v15 = vpop.f32.mrf.mxu1 }
 0x6e7   : > { %v2227_v16 = vsub.f32 %v2222_v15, %v2226_v60  ;;  %v2235_v24 = vsub.f32 %v5054_v28, %v2234_v21  ;;  %v2236_v25 = vsub.f32 %v5056_v30, %v2234_v21  ;;  %v4324_v60 = vld [vmem:[%s5364_s13] sm:$0xff]   ;;  %v4325_v14 = vld [vmem:[%s5364_s13 + $0x88] sm:$0xff]  }
 0x6e8   : > { %v4075_v18 = vpop.f32.mrf.mxu1  ;;  %4103 = vmatpush3.bf16.msra.mxu1 %v4325_v14  ;;  %v4326_v15 = vld [vmem:[%s5364_s13 + $0x80] sm:$0xff]  }
 0x6e9   : > { %v2228_v19 = vmax.f32 %v2227_v16, 0.0  ;;  %4104 = vmatprep.subr.bf16.mxu1 %v4518_v0 }
 0x6eb   : > { %v2229_v20 = vadd.f32 1e-05, %v2228_v19 }
 0x6ec   : > { %4105 = vmatpush3.bf16.msra.mxu1 %v4326_v15 }
 0x6ed   : > { %4355 = vrsqrt.f32 %v2229_v20  ;;  %4145 = vmatprep.subr.mxu1 %v4518_v0 }
 0x6fa   : > { %v4356_v23 = vpop.eup %4355 }
 0x6fb   : > { %v2240_v17 = vrot.slane %v4356_v23, %v4767_v49 }
 0x6fd   : > { %v2242_v27 = vmul.f32 %v2240_v17, %v2236_v25  ;;  %v2241_v31 = vmul.f32 %v2240_v17, %v2235_v24 }
 0x6ff   : > { %v2248_v32 = vmul.f32 %v2246_v26, %v2242_v27  ;;  %v2247_v59 = vmul.f32 %v2246_v26, %v2241_v31 }
 0x701   : > { %v2254_v33 = vadd.f32 %v2252_v29, %v2248_v32  ;;  %v2253_v34 = vadd.f32 %v2252_v29, %v2247_v59 }
 0x703   : > { %v2256_v35 = vmax.f32 %v2254_v33, 0.0  ;;  %v2255_v36 = vmax.f32 %v2253_v34, 0.0 }
 0x705   : > { %4076 = vmatprep.subr.mxu0 %v2256_v35  ;;  %v2456_v41 = vpack.c.bf16 %v2256_v35, %v2255_v36 }
 0x706   : > { %4077 = vmatpush3.msra.mxu0 %v2256_v35 }
 0x707   : > { %4078 = vmatprep.subr.mxu0 %v2255_v36 }
 0x708   : > { %4079 = vmatpush3.msra.mxu0 %v2255_v36 }
 0x709   : > { %4081 = vmatmul.mubr.msk.f32.vlgmr.msra.gmra.mxu0 %vm933_vm3, %v4783_v2  ;;  %4083 = vmatprep.subr.mxu0 %v2256_v35 }
 0x70a   : > { %4084 = vmatpush3.msra.mxu0 %v2256_v35  ;;  %4087 = vmatprep.mubr.msk.f32.mxu0 %vm933_vm3, %v4760_v40  ;;  %v4327_v35 = vld [vmem:[%s5366_s15 + $0x78] sm:$0xff]  }
 0x70b   : > { %4085 = vmatprep.subr.mxu0 %v2255_v36 }
 0x70c   : > { %4086 = vmatpush3.msra.mxu0 %v2255_v36  ;;  %v4328_v36 = vld [vmem:[%s5366_s15 + $0x38] sm:$0xff]  }
 0x70d   : > { %4088 = vmatmul.mubr.msk.f32.vlgmr.msra.gmra.mxu0 %vm933_vm3, %v4787_v4  ;;  %3726 = vmatprep.subr.bf16.mxu0 %v4303_v37  ;;  %v4329_v37 = vld [vmem:[%s5366_s15 + $0x70] sm:$0xff]  }
 0x70e   : > { %2634 = vmatprep.mubr.bf16.mxu0 %v2456_v41  ;;  %3727 = vmatpush3.bf16.msra.mxu0 %v4304_v3  ;;  %v4330_v3 = vld [vmem:[%s5366_s15 + $0x30] sm:$0xff]   ;;  %v4335_v41 = vld [vmem:[%s5366_s15 + $0x60] sm:$0xff]  }
 0x70f   : > { %3728 = vmatprep.subr.bf16.mxu0 %v4305_v39  ;;  %v4333_v39 = vld [vmem:[%s5366_s15 + $0x28] sm:$0xff]  }
 0x712   : > { %3729 = vmatpush3.bf16.msra.mxu0 %v4306_v42  ;;  %v4336_v42 = vld [vmem:[%s5366_s15 + $0x20] sm:$0xff]  }
 0x713   : > { %3730 = vmatprep.subr.bf16.mxu0 %v4308_v43  ;;  %v4338_v43 = vld [vmem:[%s5366_s15 + $0x58] sm:$0xff]  }
 0x716   : > { %3731 = vmatpush3.bf16.msra.mxu0 %v4309_v44  ;;  %v4339_v44 = vld [vmem:[%s5366_s15 + $0x18] sm:$0xff]  }
 0x717   : > { %3732 = vmatprep.subr.bf16.mxu0 %v4311_v45  ;;  %v4341_v45 = vld [vmem:[%s5366_s15 + $0x50] sm:$0xff]  }
 0x71a   : > { %3733 = vmatpush3.bf16.msra.mxu0 %v4312_v46  ;;  %v4342_v46 = vld [vmem:[%s5366_s15 + $0x10] sm:$0xff]  }
 0x71b   : > { %3734 = vmatprep.subr.bf16.mxu0 %v4314_v47  ;;  %v4344_v47 = vld [vmem:[%s5366_s15 + $0x48] sm:$0xff]  }
 0x71e   : > { %3735 = vmatpush3.bf16.msra.mxu0 %v4315_v48  ;;  %v4345_v48 = vld [vmem:[%s5366_s15 + $0x8] sm:$0xff]  }
 0x71f   : > { %3736 = vmatprep.subr.bf16.mxu0 %v4317_v50 }
 0x722   : > { %3737 = vmatpush3.bf16.msra.mxu0 %v4318_v51 }
 0x723   : > { %3738 = vmatprep.subr.bf16.mxu0 %v4320_v56 }
 0x726   : > { %3739 = vmatpush3.bf16.msra.mxu0 %v4321_v57 }
 0x727   : > { %3740 = vmatprep.subr.bf16.mxu0 %v4323_v58 }
 0x72a   : > { %3741 = vmatpush3.bf16.msra.mxu0 %v4324_v60 }
 0x72b   : > { %4110 = vmatprep.subr.mxu0 %v4518_v0 }
 0x7c9   : > { %v4082_v16 = vpop.f32.mrf.mxu0 }
 0x7cb   : > { %v2371_v18 = vpop.f32.mrf.mxu0 }
 0x7cc   : > { %v2455_v19 = vpack.c.bf16 %v4082_v16, %v2371_v18  ;;  %v2684_v18 = vld [vmem:[%s674_s0] sm:$0x3] }
 0x7cd   : > { %v4089_v20 = vpop.f32.mrf.mxu0 }
 0x7ce   : > { %2635 = vmatmul.mubr.bf16.vlgmr.msra.gmra.mxu0 %v2455_v19 }
 0x7cf   : > { %v2446_v21 = vpop.f32.mrf.mxu0  ;;  %4111 = vmatpush3.msra.mxu0 %v4897_v53  ;;  %4142 = vmatprep.mubr.msk.f32.mxu0 %vm4519_vm0, %v4518_v0 }
 0x7d0   : > { %v2457_v22 = vpack.c.bf16 %v4089_v20, %v2446_v21  ;;  %4112 = vmatprep.subr.mxu0 %v4518_v0 }
 0x7d1   : > { %4113 = vmatpush3.msra.mxu0 %v4904_v54 }
 0x7d2   : > { %4107 = vmatmul.mubr.bf16.vlgmr.msra.gmra.mxu1 %v2457_v22  ;;  %4114 = vmatprep.subr.mxu0 %v4518_v0 }
 0x7d3   : > { %4146 = vmatpush3.msra.mxu1 %v4897_v53  ;;  %4115 = vmatpush3.msra.mxu0 %v4913_v55 }
 0x7d4   : > { %4147 = vmatprep.subr.mxu1 %v4518_v0  ;;  %4116 = vmatprep.subr.mxu0 %v4518_v0 }
 0x7d5   : > { %4148 = vmatpush3.msra.mxu1 %v4904_v54  ;;  %4117 = vmatpush3.msra.mxu0 %v4934_v61 }
 0x7d6   : > { %4149 = vmatprep.subr.mxu1 %v4518_v0  ;;  %4118 = vmatprep.subr.mxu0 %v4518_v0 }
 0x7d7   : > { %4150 = vmatpush3.msra.mxu1 %v4913_v55  ;;  %4119 = vmatpush3.msra.mxu0 %v4942_v62 }
 0x7d8   : > { %4151 = vmatprep.subr.mxu1 %v4518_v0  ;;  %4120 = vmatprep.subr.mxu0 %v4518_v0 }
 0x7d9   : > { %4152 = vmatpush3.msra.mxu1 %v4934_v61  ;;  %4121 = vmatpush3.msra.mxu0 %v4951_v63 }
 0x7da   : > { %4153 = vmatprep.subr.mxu1 %v4518_v0  ;;  %4122 = vmatprep.subr.mxu0 %v4518_v0 }
 0x7db   : > { %4154 = vmatpush3.msra.mxu1 %v4942_v62  ;;  %4123 = vmatpush3.msra.mxu0 %v4960_v1 }
 0x7dc   : > { %4155 = vmatprep.subr.mxu1 %v4518_v0  ;;  %4124 = vmatprep.subr.mxu0 %v4518_v0 }
 0x7dd   : > { %4156 = vmatpush3.msra.mxu1 %v4951_v63  ;;  %4125 = vmatpush3.msra.mxu0 %v4969_v5 }
 0x7de   : > { %4157 = vmatprep.subr.mxu1 %v4518_v0  ;;  %4126 = vmatprep.subr.mxu0 %v4518_v0 }
 0x7df   : > { %4158 = vmatpush3.msra.mxu1 %v4960_v1  ;;  %4127 = vmatpush3.msra.mxu0 %v4978_v6 }
 0x7e0   : > { %4159 = vmatprep.subr.mxu1 %v4518_v0  ;;  %4128 = vmatprep.subr.mxu0 %v4518_v0 }
 0x7e1   : > { %4160 = vmatpush3.msra.mxu1 %v4969_v5  ;;  %4129 = vmatpush3.msra.mxu0 %v4987_v7 }
 0x7e2   : > { %4161 = vmatprep.subr.mxu1 %v4518_v0  ;;  %4130 = vmatprep.subr.mxu0 %v4518_v0 }
 0x7e3   : > { %4162 = vmatpush3.msra.mxu1 %v4978_v6  ;;  %4131 = vmatpush3.msra.mxu0 %v4994_v8 }
 0x7e4   : > { %4163 = vmatprep.subr.mxu1 %v4518_v0  ;;  %4132 = vmatprep.subr.mxu0 %v4518_v0 }
 0x7e5   : > { %4164 = vmatpush3.msra.mxu1 %v4987_v7  ;;  %4133 = vmatpush3.msra.mxu0 %v5002_v9 }
 0x7e6   : > { %4165 = vmatprep.subr.mxu1 %v4518_v0  ;;  %4134 = vmatprep.subr.mxu0 %v4518_v0 }
 0x7e7   : > { %4166 = vmatpush3.msra.mxu1 %v4994_v8  ;;  %4135 = vmatpush3.msra.mxu0 %v5011_v10 }
 0x7e8   : > { %4167 = vmatprep.subr.mxu1 %v4518_v0  ;;  %4136 = vmatprep.subr.mxu0 %v4518_v0 }
 0x7e9   : > { %4168 = vmatpush3.msra.mxu1 %v5002_v9  ;;  %4137 = vmatpush3.msra.mxu0 %v5020_v11 }
 0x7ea   : > { %4169 = vmatprep.subr.mxu1 %v4518_v0  ;;  %4138 = vmatprep.subr.mxu0 %v4518_v0 }
 0x7eb   : > { %4170 = vmatpush3.msra.mxu1 %v5011_v10  ;;  %4139 = vmatpush3.msra.mxu0 %v5029_v12 }
 0x7ec   : > { %4171 = vmatprep.subr.mxu1 %v4518_v0  ;;  %4140 = vmatprep.subr.mxu0 %v4518_v0 }
 0x7ed   : > { %4172 = vmatpush3.msra.mxu1 %v5020_v11  ;;  %4141 = vmatpush3.msra.mxu0 %v5038_v13 }
 0x7ee   : > { %4173 = vmatprep.subr.mxu1 %v4518_v0  ;;  %4177 = vmatprep.mubr.msk.f32.mxu1 %vm4519_vm0, %v4518_v0 }
 0x7ef   : > { %4174 = vmatpush3.msra.mxu1 %v5029_v12 }
 0x7f0   : > { %4175 = vmatprep.subr.mxu1 %v4518_v0 }
 0x7f1   : > { %4176 = vmatpush3.msra.mxu1 %v5038_v13 }
 0x7f2   : > { %3799 = vmatprep.subr.bf16.mxu1 %v4327_v35 }
 0x88e   : > { %v3742_v53 = vpop.f32.mrf.mxu0 }
 0x890   : > { %v3743_v54 = vpop.f32.mrf.mxu0 }
 0x891   : > { %v3744_v55 = vadd.f32 %v3743_v54, %v3742_v53  ;;  %v2861_v53 = vrot.slane %v2684_v18, %v4767_v49 }
 0x892   : > { %v3745_v61 = vpop.f32.mrf.mxu0  ;;  %v2677_v62 = vpop.f32.mrf.mxu1 }
 0x893   : > { %v5231_v5 = vadd.f32 %v3744_v55, %v2677_v62  ;;  %v2867_v55 = vrot.slane %v2684_v18, %v4774_v52  ;;  %v4334_v52 = vld [vmem:[%s5366_s15 + $0xb0] sm:$0xff]  }
 0x894   : > { %v3746_v63 = vpop.f32.mrf.mxu0  ;;  %v4108_v1 = vpop.f32.mrf.mxu1 }
 0x895   : > { %v3747_v6 = vadd.f32 %v3746_v63, %v3745_v61  ;;  %v2692_v10 = vmul.f32 %v5231_v5, %v5231_v5 }
 0x896   : > { %v2680_v7 = vpop.f32.mrf.mxu1 }
 0x897   : > { %v5233_v8 = vadd.f32 %v3747_v6, %v2680_v7 }
 0x898   : > { %v4109_v9 = vpop.f32.mrf.mxu1 }
 0x899   : > { %v2685_v11 = vadd.f32 %v5233_v8, %v5231_v5  ;;  %v2693_v12 = vmul.f32 %v5233_v8, %v5233_v8 }
 0x89b   : > { %v2686_v13 = vrot.slane %v2685_v11, 4  ;;  %v2694_v23 = vadd.f32 %v2693_v12, %v2692_v10  ;;  %v4349_v12 = vld [vmem:[%s5366_s15 + $0x88] sm:$0xff]  }
 0x89d   : > { %v2687_v24 = vadd.f32 %v2686_v13, %v2685_v11  ;;  %v2695_v25 = vrot.slane %v2694_v23, 4  ;;  %v4348_v11 = vld [vmem:[%s5366_s15] sm:$0xff]  }
 0x89e   : > { %v4350_v13 = vld [vmem:[%s5366_s15 + $0x80] sm:$0xff]  }
 0x89f   : > { %v2688_v17 = vrot.slane %v2687_v24, 2  ;;  %v2696_v26 = vadd.f32 %v2695_v25, %v2694_v23 }
 0x8a1   : > { %v2689_v27 = vadd.f32 %v2688_v17, %v2687_v24  ;;  %v2697_v29 = vrot.slane %v2696_v26, 2 }
 0x8a3   : > { %v2690_v31 = vrot.slane %v2689_v27, 1  ;;  %v2698_v32 = vadd.f32 %v2697_v29, %v2696_v26 }
 0x8a5   : > { %v2691_v59 = vadd.f32 %v2690_v31, %v2689_v27  ;;  %v2699_v33 = vrot.slane %v2698_v32, 1 }
 0x8a7   : > { %4143 = vmatmul.mubr.f32.vlgmr.msra.gmra.mxu0 %v2691_v59  ;;  %v2700_v34 = vadd.f32 %v2699_v33, %v2698_v32 }
 0x8a8   : > { %4184 = vmatprep.mubr.msk.f32.mxu0 %vm933_vm3, %v4755_v38  ;;  %v4332_v38 = vld [vmem:[%s5366_s15 + $0x68] sm:$0xff]  }
 0x8a9   : > { %4178 = vmatmul.mubr.f32.vlgmr.msra.gmra.mxu1 %v2700_v34 }
 0x8aa   : > { %3800 = vmatpush3.bf16.msra.mxu1 %v4328_v36 }
 0x8ab   : > { %3801 = vmatprep.subr.bf16.mxu1 %v4329_v37 }
 0x8ae   : > { %3802 = vmatpush3.bf16.msra.mxu1 %v4330_v3 }
 0x8af   : > { %3803 = vmatprep.subr.bf16.mxu1 %v4332_v38 }
 0x8b2   : > { %3804 = vmatpush3.bf16.msra.mxu1 %v4333_v39 }
 0x8b3   : > { %3805 = vmatprep.subr.bf16.mxu1 %v4335_v41 }
 0x8b6   : > { %3806 = vmatpush3.bf16.msra.mxu1 %v4336_v42 }
 0x8b7   : > { %3807 = vmatprep.subr.bf16.mxu1 %v4338_v43 }
 0x8ba   : > { %3808 = vmatpush3.bf16.msra.mxu1 %v4339_v44 }
 0x8bb   : > { %3809 = vmatprep.subr.bf16.mxu1 %v4341_v45 }
 0x8be   : > { %3810 = vmatpush3.bf16.msra.mxu1 %v4342_v46 }
 0x8bf   : > { %3811 = vmatprep.subr.bf16.mxu1 %v4344_v47 }
 0x8c2   : > { %3812 = vmatpush3.bf16.msra.mxu1 %v4345_v48 }
 0x967   : > { %v2767_v50 = vpop.f32.mrf.mxu0 }
 0x968   : > { %v2841_v51 = vmul.f32 %v2767_v50, %v2767_v50  ;;  %v2849_v16 = vrot.slane %v2767_v50, %v4767_v49 }
 0x969   : > { %v4144_v56 = vpop.f32.mrf.mxu0  ;;  %v2837_v57 = vpop.f32.mrf.mxu1 }
 0x96a   : > { %v2842_v58 = vsub.f32 %v2837_v57, %v2841_v51  ;;  %v2850_v20 = vsub.f32 %v5231_v5, %v2849_v16  ;;  %v2851_v21 = vsub.f32 %v5233_v8, %v2849_v16  ;;  %v4346_v5 = vld [vmem:[%s5366_s15 + $0x90] sm:$0xff]   ;;  %v4347_v8 = vld [vmem:[%s5366_s15 + $0x40] sm:$0xff]  }
 0x96b   : > { %v4179_v60 = vpop.f32.mrf.mxu1  ;;  %3813 = vmatprep.subr.bf16.mxu1 %v4347_v8 }
 0x96c   : > { %v2843_v14 = vmax.f32 %v2842_v58, 0.0  ;;  %3814 = vmatpush3.bf16.msra.mxu1 %v4348_v11 }
 0x96e   : > { %v2844_v15 = vadd.f32 1e-05, %v2843_v14 }
 0x970   : > { %4357 = vrsqrt.f32 %v2844_v15 }
 0x97d   : > { %v4358_v19 = vpop.eup %4357 }
 0x97e   : > { %v2855_v22 = vrot.slane %v4358_v19, %v4767_v49  ;;  %v4331_v49 = vld [vmem:[%s5366_s15 + $0xb8] sm:$0xff]  }
 0x980   : > { %v2857_v54 = vmul.f32 %v2855_v22, %v2851_v21  ;;  %v2856_v61 = vmul.f32 %v2855_v22, %v2850_v20 }
 0x982   : > { %v2863_v62 = vmul.f32 %v2861_v53, %v2857_v54  ;;  %v2862_v63 = vmul.f32 %v2861_v53, %v2856_v61 }
 0x984   : > { %v2869_v1 = vadd.f32 %v2867_v55, %v2863_v62  ;;  %v2868_v6 = vadd.f32 %v2867_v55, %v2862_v63 }
 0x986   : > { %v2871_v7 = vmax.f32 %v2869_v1, 0.0  ;;  %v2870_v9 = vmax.f32 %v2868_v6, 0.0 }
 0x988   : > { %4180 = vmatprep.subr.mxu0 %v2871_v7  ;;  %v3071_v10 = vpack.c.bf16 %v2871_v7, %v2870_v9 }
 0x989   : > { %4181 = vmatpush3.msra.mxu0 %v2871_v7 }
 0x98a   : > { %4182 = vmatprep.subr.mxu0 %v2870_v9  ;;  %3249 = vmatprep.mubr.bf16.mxu1 %v3071_v10 }
 0x98b   : > { %4183 = vmatpush3.msra.mxu0 %v2870_v9 }
 0x98c   : > { %4185 = vmatmul.mubr.msk.f32.vlgmr.msra.gmra.mxu0 %vm933_vm3, %v4783_v2  ;;  %4187 = vmatprep.subr.mxu0 %v2871_v7  ;;  %v4340_v2 = vld [vmem:[%s5366_s15 + $0xa0] sm:$0xff]  }
 0x98d   : > { %4188 = vmatpush3.msra.mxu0 %v2871_v7  ;;  %4191 = vmatprep.mubr.msk.f32.mxu0 %vm933_vm3, %v4760_v40  ;;  %v4337_v40 = vld [vmem:[%s5366_s15 + $0xa8] sm:$0xff]  }
 0x98e   : > { %4189 = vmatprep.subr.mxu0 %v2870_v9 }
 0x98f   : > { %4190 = vmatpush3.msra.mxu0 %v2870_v9 }
 0x990   : > { %4192 = vmatmul.mubr.msk.f32.vlgmr.msra.gmra.mxu0 %vm933_vm3, %v4787_v4  ;;  %4194 = vmatprep.subr.bf16.mxu0 %v4518_v0  ;;  %v4343_v4 = vld [vmem:[%s5366_s15 + $0x98] sm:$0xff]  }
 0x991   : > { %4195 = vmatpush3.bf16.msra.mxu0 %v4331_v49  ;;  %4210 = vmatprep.mubr.msk.bf16.mxu0 %vm4519_vm0, %v4518_v0 }
 0x992   : > { %4196 = vmatprep.subr.bf16.mxu0 %v4518_v0 }
 0x995   : > { %4197 = vmatpush3.bf16.msra.mxu0 %v4334_v52 }
 0x996   : > { %4198 = vmatprep.subr.bf16.mxu0 %v4518_v0 }
 0x999   : > { %4199 = vmatpush3.bf16.msra.mxu0 %v4337_v40 }
 0x99a   : > { %4200 = vmatprep.subr.bf16.mxu0 %v4518_v0 }
 0x99d   : > { %4201 = vmatpush3.bf16.msra.mxu0 %v4340_v2 }
 0x99e   : > { %4202 = vmatprep.subr.bf16.mxu0 %v4518_v0 }
 0x9a1   : > { %4203 = vmatpush3.bf16.msra.mxu0 %v4343_v4 }
 0x9a2   : > { %4204 = vmatprep.subr.bf16.mxu0 %v4518_v0 }
 0x9a5   : > { %4205 = vmatpush3.bf16.msra.mxu0 %v4346_v5 }
 0x9a6   : > { %4206 = vmatprep.subr.bf16.mxu0 %v4518_v0 }
 0x9a9   : > { %4207 = vmatpush3.bf16.msra.mxu0 %v4349_v12 }
 0x9aa   : > { %4208 = vmatprep.subr.bf16.mxu0 %v4518_v0 }
 0x9ad   : > { %4209 = vmatpush3.bf16.msra.mxu0 %v4350_v13 }
 0xa4c   : > { %v4186_v23 = vpop.f32.mrf.mxu0 }
 0xa4e   : > { %v2986_v24 = vpop.f32.mrf.mxu0 }
 0xa4f   : > { %v3070_v25 = vpack.c.bf16 %v4186_v23, %v2986_v24 }
 0xa50   : > { %v4193_v17 = vpop.f32.mrf.mxu0 }
 0xa51   : > { %3250 = vmatmul.mubr.bf16.vlgmr.msra.gmra.mxu1 %v3070_v25 }
 0xa52   : > { %v3061_v26 = vpop.f32.mrf.mxu0 }
 0xa53   : > { %v3072_v27 = vpack.c.bf16 %v4193_v17, %v3061_v26 }
 0xa55   : > { %4211 = vmatmul.mubr.bf16.vlgmr.msra.gmra.mxu0 %v3072_v27 }
 0xb11   : > { %v3815_v29 = vpop.f32.mrf.mxu1 }
 0xb13   : > { %v3816_v31 = vpop.f32.mrf.mxu1 }
 0xb14   : > { %v3817_v32 = vadd.f32 %v3816_v31, %v3815_v29 }
 0xb15   : > { %v3818_v59 = vpop.f32.mrf.mxu1  ;;  %v3292_v33 = vpop.f32.mrf.mxu0 }
 0xb16   : > { %v3252_v0 = vadd.f32 %v3817_v32, %v5054_v28 }
 0xb17   : > { %v3819_v34 = vpop.f32.mrf.mxu1  ;;  %v4212_v35 = vpop.f32.mrf.mxu0 }
 0xb18   : > { %v3293_v36 = vadd.f32 %v3292_v33, %v3252_v0  ;;  %v3820_v37 = vadd.f32 %v3819_v34, %v3818_v59 }
 0xb19   : > { %v3295_v3 = vpop.f32.mrf.mxu0 }
 0xb1a   : > { %3299 = vst [vmem:[%s679_s20] sm:$0xff] %v3293_v36  ;;  %v3255_v38 = vadd.f32 %v3820_v37, %v5056_v30 }
 0xb1b   : > { %v4213_v39 = vpop.f32.mrf.mxu0 }
 0xb1c   : > { %v3296_v41 = vadd.f32 %v3295_v3, %v3255_v38 }
 0xb1e   : > { %3300 = vst [vmem:[%s679_s20 + $0x8] sm:$0xff] %v3296_v41 }
 0xb1f PF: > { %s29_s21 = sadd.s32 1, %s4507_s21  }
 0xb20   : > { %p26_p2 = scmp.ge.s32.totalorder %s29_s21, 4  }
 0xb22   :  { %28 = sbr.rel (!%p26_p2) target bundleno = 6 (0x6), region = 150 }
 0xb27   :  { %3322 = vsyncpa [#allocation3], 1 }
 0xb28   :  { %3324 = vsyncpa [#allocation3 + $0x1], 1 }
 0xb29   :  { %3325 = vsyncpa [#allocation5], 1 }
 0xb2a   :  { %3326 = vsyncpa [#allocation8], 1 }

</bundles_post_ra>
